<compile_context>
chip_gen: v6e
topology: v6e:2x2x1
jax: 0.10.0
libtpu: 0.0.40
codegen_flags: <defaults>
</compile_context>

<pallas_src>
import numpy as np
import jax
import jax.numpy as jnp
from jax.experimental import pallas as pl
from jax.experimental.pallas import tpu as pltpu


def _round_up(x, m):
    return (x + m - 1) // m * m


def _make_kernel(T, T_pad, R, hop, F_pad, C_stride, eps):
    def kernel(ch_ref, basis_ref, out_ref, frames_ref):
        # ch_ref     : (1, 2*C_stride, hop) bf16   [enh chunks | clean chunks]
        # basis_ref  : (fft, 2*F_pad)       bf16   window-folded [cos | -sin]
        # out_ref    : (1, 8, F_pad)        f32    per-batch partial sums
        # frames_ref : (2*T_pad, fft)       bf16   VMEM scratch, framed operand

        # ---- assemble the framed operand: frame t = chunks[t : t+R] ---------
        for j in range(R):                       # static & small (fft // hop)
            lo = j * hop
            frames_ref[0:T_pad, lo:lo + hop] = ch_ref[0, j:j + T_pad, :]
            frames_ref[T_pad:2 * T_pad, lo:lo + hop] = (
                ch_ref[0, C_stride + j:C_stride + j + T_pad, :])

        # ---- one MXU matmul, K = fft_size, f32 accumulation ------------------
        sp = jnp.dot(frames_ref[...], basis_ref[...],
                     preferred_element_type=jnp.float32)   # (2*T_pad, 2*F_pad)

        er = sp[0:T_pad, 0:F_pad]
        ei = sp[0:T_pad, F_pad:2 * F_pad]
        cr = sp[T_pad:2 * T_pad, 0:F_pad]
        ci = sp[T_pad:2 * T_pad, F_pad:2 * F_pad]

        pe = er * er + ei * ei                   # enhanced power, (T_pad, F_pad)
        pc = cr * cr + ci * ci                   # clean power
        if T_pad != T:                           # zero contribution of pad frames
            rows = jax.lax.broadcasted_iota(jnp.int32, (T_pad, F_pad), 0)
            keep = rows < T
            pe = jnp.where(keep, pe, 0.0)
            pc = jnp.where(keep, pc, 0.0)

        mag_e = jnp.sqrt(pe)
        mag_c = jnp.sqrt(pc)

        # Per-batch Frobenius norms: reduce over T (sublanes) first, then a
        # single (1, F_pad) lane reduction.
        pe_row = jnp.sum(pe, axis=0, keepdims=True)          # (1, F_pad)
        pc_row = jnp.sum(pc, axis=0, keepdims=True)          # (1, F_pad)
        ne = jnp.sqrt(jnp.sum(pe_row, keepdims=True))        # (1, 1)
        nc = jnp.sqrt(jnp.sum(pc_row, keepdims=True))
        inv_ne = pl.reciprocal(ne + eps)
        inv_nc = pl.reciprocal(nc + eps)

        norm_diff = jnp.abs(mag_e * inv_ne - mag_c * inv_nc)
        diff = mag_e - mag_c

        # Single merged lane-dense output block (rows 3..7 are padding).
        out_ref[0, 0:1, :] = jnp.sum(norm_diff, axis=0, keepdims=True)
        out_ref[0, 1:2, :] = jnp.sum(diff * diff, axis=0, keepdims=True)
        out_ref[0, 2:3, :] = pc_row
        out_ref[0, 3:8, :] = jnp.zeros((5, F_pad), jnp.float32)

    return kernel


def gsenet_stft_loss(enhanced_wav, clean, *, fft_size=1024, hop_size=256,
                     win_size=1024):
    """GSENet STFT loss (scalar) computed with a Pallas TPU kernel."""
    assert win_size == fft_size, "kernel assumes win_length == n_fft"
    assert fft_size % hop_size == 0, "kernel assumes hop_size divides fft_size"
    B, L = enhanced_wav.shape
    N = fft_size
    F = N // 2 + 1
    F_pad = _round_up(F, 128)              # lane-align the frequency axis
    R = N // hop_size                      # hop-chunks per frame
    T = 1 + L // hop_size                  # torch.stft(center=True) frame count
    T_pad = _round_up(T, 16)               # sublane-align (also bf16 packing)
    C = T - 1 + R                          # real hop-chunks needed
    C_stride = _round_up(T_pad + R - 1, 16)  # per-stream row stride (zero pad)
    eps = 1e-8

    # --- glue: reflect pad (torch.stft center=True), cut into non-overlapping
    #           hop-sized chunks, zero-pad rows, cast to bf16 in the wrapper ---
    pad = N // 2

    def to_chunks(x):
        xp = jnp.pad(x.astype(jnp.float32), ((0, 0), (pad, pad)), mode="reflect")
        ch = xp[:, :C * hop_size].reshape(B, C, hop_size)
        ch = jnp.pad(ch, ((0, 0), (0, C_stride - C), (0, 0)))
        return ch.astype(jnp.bfloat16)

    # Enhanced and clean stacked along the chunk-row axis -> one LHS stream.
    chunks = jnp.concatenate([to_chunks(enhanced_wav), to_chunks(clean)], axis=1)

    # --- glue: window-folded DFT basis, [cos | -sin], F zero-padded to F_pad,
    #           flat (N, 2*F_pad), bf16 (MXU input) ---
    n = np.arange(N, dtype=np.float64)
    win = 0.5 - 0.5 * np.cos(2.0 * np.pi * n / N)            # periodic hann
    k = np.arange(F, dtype=np.float64)
    ang = 2.0 * np.pi * n[:, None] * k[None, :] / N
    basis_np = np.zeros((N, 2 * F_pad), dtype=np.float32)
    basis_np[:, :F] = win[:, None] * np.cos(ang)
    basis_np[:, F_pad:F_pad + F] = win[:, None] * (-np.sin(ang))
    basis = jnp.asarray(basis_np, dtype=jnp.bfloat16)

    kernel = _make_kernel(T, T_pad, R, hop_size, F_pad, C_stride, eps)

    parts = pl.pallas_call(
        kernel,
        out_shape=jax.ShapeDtypeStruct((B, 8, F_pad), jnp.float32),
        grid_spec=pltpu.PrefetchScalarGridSpec(
            num_scalar_prefetch=0,
            grid=(B,),
            in_specs=[
                pl.BlockSpec((1, 2 * C_stride, hop_size), lambda b: (b, 0, 0)),
                pl.BlockSpec((N, 2 * F_pad), lambda b: (0, 0)),   # grid-invariant
            ],
            out_specs=pl.BlockSpec((1, 8, F_pad), lambda b: (b, 0, 0)),
            scratch_shapes=[pltpu.VMEM((2 * T_pad, N), jnp.bfloat16)],
        ),
        compiler_params=pltpu.CompilerParams(
            dimension_semantics=("parallel",),    # no cross-batch state
            vmem_limit_bytes=48 * 1024 * 1024,
        ),
    )(chunks, basis)

    # Tiny final combine in plain JAX (padded rows/columns are exact zeros).
    total = float(B * T * F)                     # true (un-padded) element count
    mag_loss = jnp.sum(parts[:, 0, :]) / total
    spec_loss = (jnp.sqrt(jnp.sum(parts[:, 1, :]))
                 / (jnp.sqrt(jnp.sum(parts[:, 2, :])) + eps))
    return mag_loss + spec_loss


def _reference_loss(enhanced_wav, clean, *, fft_size, hop_size, win_size):
    """Pure-JAX f32 reference (same STFT definition) for correctness check."""
    N = fft_size
    F = N // 2 + 1
    pad = N // 2
    hp = jax.lax.Precision.HIGHEST

    def stft_mag(x):
        xp = jnp.pad(x.astype(jnp.float32), ((0, 0), (pad, pad)), mode="reflect")
        T = 1 + x.shape[1] // hop_size
        starts = jnp.arange(T) * hop_size
        idx = starts[:, None] + jnp.arange(N)[None, :]
        frames = xp[:, idx]
        n = jnp.arange(N, dtype=jnp.float32)
        w = 0.5 - 0.5 * jnp.cos(2.0 * jnp.pi * n / N)
        frames = frames * w[None, None, :]
        k = jnp.arange(F, dtype=jnp.float32)
        ang = 2.0 * jnp.pi * n[:, None] * k[None, :] / N
        re = jnp.einsum("btn,nf->btf", frames, jnp.cos(ang), precision=hp)
        im = jnp.einsum("btn,nf->btf", frames, -jnp.sin(ang), precision=hp)
        return jnp.sqrt(re * re + im * im)

    eps = 1e-8
    me, mc = stft_mag(enhanced_wav), stft_mag(clean)
    ne = jnp.sqrt(jnp.sum(me * me, axis=(1, 2), keepdims=True))
    nc = jnp.sqrt(jnp.sum(mc * mc, axis=(1, 2), keepdims=True))
    mag_loss = jnp.mean(jnp.abs(me / (ne + eps) - mc / (nc + eps)))
    spec_loss = jnp.sqrt(jnp.sum((me - mc) ** 2)) / (jnp.sqrt(jnp.sum(mc * mc)) + eps)
    return mag_loss + spec_loss


if __name__ == "__main__":
    # Small shapes consistent with the module (fft/hop ratio = 4 like 1024/256),
    # with hop a multiple of 128 so the framed-operand writes stay lane-aligned:
    # B=2 waveforms of 2048 samples, fft=512, hop=128, win=512
    #   -> F=257 (padded to 384 lanes), T=17 frames (padded to 32), R=4.
    fft_size, hop_size, win_size = 512, 128, 512
    B, L = 2, 2048

    key = jax.random.PRNGKey(0)
    k1, k2 = jax.random.split(key)
    clean = jax.random.normal(k1, (B, L), dtype=jnp.float32)
    enhanced = clean + 0.1 * jax.random.normal(k2, (B, L), dtype=jnp.float32)

    loss = gsenet_stft_loss(enhanced, clean, fft_size=fft_size,
                            hop_size=hop_size, win_size=win_size)
    loss = jax.block_until_ready(loss)

    ref = jax.block_until_ready(
        _reference_loss(enhanced, clean, fft_size=fft_size,
                        hop_size=hop_size, win_size=win_size))
    # bf16 matmul inputs (f32 accumulation) -> tolerance loosened vs pure f32.
    np.testing.assert_allclose(np.asarray(loss), np.asarray(ref),
                               rtol=2e-2, atol=2e-3)
    print("KERNEL_OK")
</pallas_src>

<mosaic_0001>
module attributes {stable_mosaic.version = 11 : i64} {
  func.func @kernel(%arg0: i32, %arg1: memref<1x96x128xbf16, #tpu.memory_space<vmem>>, %arg2: memref<512x768xbf16, #tpu.memory_space<vmem>>, %arg3: memref<1x8x384xf32, #tpu.memory_space<vmem>>, %arg4: memref<64x512xbf16, #tpu.memory_space<vmem>>) attributes {dimension_semantics = [#tpu.dimension_semantics<parallel>], iteration_bounds = array<i64: 2>, scalar_prefetch = 0 : i64, scratch_operands = 1 : i64, tpu.core_type = #tpu.core_type<tc>, window_params = [{transform_indices = @transform_0, window_bounds = array<i64: 1, 96, 128>}, {pipeline_mode = #tpu.pipeline_mode<synchronous>, transform_indices = @transform_1, window_bounds = array<i64: 512, 768>}, {transform_indices = @transform_2, window_bounds = array<i64: 1, 8, 384>}]} {
    %c0 = arith.constant 0 : index
    %c0_0 = arith.constant 0 : index
    %c0_1 = arith.constant 0 : index
    %0 = vector.load %arg1[%c0, %c0_0, %c0_1] : memref<1x96x128xbf16, #tpu.memory_space<vmem>>, vector<1x32x128xbf16>
    %1 = vector.shape_cast %0 : vector<1x32x128xbf16> to vector<32x128xbf16>
    %c0_2 = arith.constant 0 : index
    %c0_3 = arith.constant 0 : index
    %2 = vector.load %arg4[%c0_2, %c0_3] : memref<64x512xbf16, #tpu.memory_space<vmem>>, vector<32x128xbf16>
    tpu.vector_store %arg4[%c0_2, %c0_3], %1 {strides = array<i32>} : memref<64x512xbf16, #tpu.memory_space<vmem>>, vector<32x128xbf16>,
    %c0_4 = arith.constant 0 : index
    %c48 = arith.constant 48 : index
    %c0_5 = arith.constant 0 : index
    %3 = vector.load %arg1[%c0_4, %c48, %c0_5] : memref<1x96x128xbf16, #tpu.memory_space<vmem>>, vector<1x32x128xbf16>
    %4 = vector.shape_cast %3 : vector<1x32x128xbf16> to vector<32x128xbf16>
    %c32 = arith.constant 32 : index
    %c0_6 = arith.constant 0 : index
    %5 = vector.load %arg4[%c32, %c0_6] : memref<64x512xbf16, #tpu.memory_space<vmem>>, vector<32x128xbf16>
    tpu.vector_store %arg4[%c32, %c0_6], %4 {strides = array<i32>} : memref<64x512xbf16, #tpu.memory_space<vmem>>, vector<32x128xbf16>,
    %c0_7 = arith.constant 0 : index
    %c1 = arith.constant 1 : index
    %c0_8 = arith.constant 0 : index
    %6 = vector.load %arg1[%c0_7, %c1, %c0_8] : memref<1x96x128xbf16, #tpu.memory_space<vmem>>, vector<1x32x128xbf16>
    %7 = vector.shape_cast %6 : vector<1x32x128xbf16> to vector<32x128xbf16>
    %c0_9 = arith.constant 0 : index
    %c128 = arith.constant 128 : index
    %8 = vector.load %arg4[%c0_9, %c128] : memref<64x512xbf16, #tpu.memory_space<vmem>>, vector<32x128xbf16>
    tpu.vector_store %arg4[%c0_9, %c128], %7 {strides = array<i32>} : memref<64x512xbf16, #tpu.memory_space<vmem>>, vector<32x128xbf16>,
    %c0_10 = arith.constant 0 : index
    %c49 = arith.constant 49 : index
    %c0_11 = arith.constant 0 : index
    %9 = vector.load %arg1[%c0_10, %c49, %c0_11] : memref<1x96x128xbf16, #tpu.memory_space<vmem>>, vector<1x32x128xbf16>
    %10 = vector.shape_cast %9 : vector<1x32x128xbf16> to vector<32x128xbf16>
    %c32_12 = arith.constant 32 : index
    %c128_13 = arith.constant 128 : index
    %11 = vector.load %arg4[%c32_12, %c128_13] : memref<64x512xbf16, #tpu.memory_space<vmem>>, vector<32x128xbf16>
    tpu.vector_store %arg4[%c32_12, %c128_13], %10 {strides = array<i32>} : memref<64x512xbf16, #tpu.memory_space<vmem>>, vector<32x128xbf16>,
    %c0_14 = arith.constant 0 : index
    %c2 = arith.constant 2 : index
    %c0_15 = arith.constant 0 : index
    %12 = vector.load %arg1[%c0_14, %c2, %c0_15] : memref<1x96x128xbf16, #tpu.memory_space<vmem>>, vector<1x32x128xbf16>
    %13 = vector.shape_cast %12 : vector<1x32x128xbf16> to vector<32x128xbf16>
    %c0_16 = arith.constant 0 : index
    %c256 = arith.constant 256 : index
    %14 = vector.load %arg4[%c0_16, %c256] : memref<64x512xbf16, #tpu.memory_space<vmem>>, vector<32x128xbf16>
    tpu.vector_store %arg4[%c0_16, %c256], %13 {strides = array<i32>} : memref<64x512xbf16, #tpu.memory_space<vmem>>, vector<32x128xbf16>,
    %c0_17 = arith.constant 0 : index
    %c50 = arith.constant 50 : index
    %c0_18 = arith.constant 0 : index
    %15 = vector.load %arg1[%c0_17, %c50, %c0_18] : memref<1x96x128xbf16, #tpu.memory_space<vmem>>, vector<1x32x128xbf16>
    %16 = vector.shape_cast %15 : vector<1x32x128xbf16> to vector<32x128xbf16>
    %c32_19 = arith.constant 32 : index
    %c256_20 = arith.constant 256 : index
    %17 = vector.load %arg4[%c32_19, %c256_20] : memref<64x512xbf16, #tpu.memory_space<vmem>>, vector<32x128xbf16>
    tpu.vector_store %arg4[%c32_19, %c256_20], %16 {strides = array<i32>} : memref<64x512xbf16, #tpu.memory_space<vmem>>, vector<32x128xbf16>,
    %c0_21 = arith.constant 0 : index
    %c3 = arith.constant 3 : index
    %c0_22 = arith.constant 0 : index
    %18 = vector.load %arg1[%c0_21, %c3, %c0_22] : memref<1x96x128xbf16, #tpu.memory_space<vmem>>, vector<1x32x128xbf16>
    %19 = vector.shape_cast %18 : vector<1x32x128xbf16> to vector<32x128xbf16>
    %c0_23 = arith.constant 0 : index
    %c384 = arith.constant 384 : index
    %20 = vector.load %arg4[%c0_23, %c384] : memref<64x512xbf16, #tpu.memory_space<vmem>>, vector<32x128xbf16>
    tpu.vector_store %arg4[%c0_23, %c384], %19 {strides = array<i32>} : memref<64x512xbf16, #tpu.memory_space<vmem>>, vector<32x128xbf16>,
    %c0_24 = arith.constant 0 : index
    %c51 = arith.constant 51 : index
    %c0_25 = arith.constant 0 : index
    %21 = vector.load %arg1[%c0_24, %c51, %c0_25] : memref<1x96x128xbf16, #tpu.memory_space<vmem>>, vector<1x32x128xbf16>
    %22 = vector.shape_cast %21 : vector<1x32x128xbf16> to vector<32x128xbf16>
    %c32_26 = arith.constant 32 : index
    %c384_27 = arith.constant 384 : index
    %23 = vector.load %arg4[%c32_26, %c384_27] : memref<64x512xbf16, #tpu.memory_space<vmem>>, vector<32x128xbf16>
    tpu.vector_store %arg4[%c32_26, %c384_27], %22 {strides = array<i32>} : memref<64x512xbf16, #tpu.memory_space<vmem>>, vector<32x128xbf16>,
    %c0_28 = arith.constant 0 : index
    %c0_29 = arith.constant 0 : index
    %24 = vector.load %arg4[%c0_28, %c0_29] : memref<64x512xbf16, #tpu.memory_space<vmem>>, vector<64x512xbf16>
    %c0_30 = arith.constant 0 : index
    %c0_31 = arith.constant 0 : index
    %25 = vector.load %arg2[%c0_30, %c0_31] : memref<512x768xbf16, #tpu.memory_space<vmem>>, vector<512x768xbf16>
    %cst = arith.constant dense<0.000000e+00> : vector<64x768xf32>
    %26 = tpu.matmul %24, %25, %cst {dimension_numbers = #tpu.dot_dimension_numbers<[1], [0], [0], [1], [0, 0, 1, 1], [], []>} : vector<64x512xbf16>, vector<512x768xbf16>, vector<64x768xf32> -> vector<64x768xf32>
    %27 = vector.extract_strided_slice %26 {offsets = [0, 0], sizes = [32, 384], strides = [1, 1]} : vector<64x768xf32> to vector<32x384xf32>
    %28 = vector.extract_strided_slice %26 {offsets = [0, 384], sizes = [32, 384], strides = [1, 1]} : vector<64x768xf32> to vector<32x384xf32>
    %29 = vector.extract_strided_slice %26 {offsets = [32, 0], sizes = [32, 384], strides = [1, 1]} : vector<64x768xf32> to vector<32x384xf32>
    %30 = vector.extract_strided_slice %26 {offsets = [32, 384], sizes = [32, 384], strides = [1, 1]} : vector<64x768xf32> to vector<32x384xf32>
    %31 = arith.mulf %27, %27 : vector<32x384xf32>
    %32 = arith.mulf %28, %28 : vector<32x384xf32>
    %33 = arith.addf %31, %32 : vector<32x384xf32>
    %34 = arith.mulf %29, %29 : vector<32x384xf32>
    %35 = arith.mulf %30, %30 : vector<32x384xf32>
    %36 = arith.addf %34, %35 : vector<32x384xf32>
    %37 = tpu.iota {dimensions = array<i32: 0>} : vector<32x384xi32>
    %c17_i32 = arith.constant 17 : i32
    %38 = vector.broadcast %c17_i32 : i32 to vector<32x384xi32>
    %39 = arith.cmpi slt, %37, %38 : vector<32x384xi32>
    %cst_32 = arith.constant 0.000000e+00 : f32
    %40 = vector.broadcast %cst_32 : f32 to vector<32x384xf32>
    %41 = arith.select %39, %33, %40 : vector<32x384xi1>, vector<32x384xf32>
    %cst_33 = arith.constant 0.000000e+00 : f32
    %42 = vector.broadcast %cst_33 : f32 to vector<32x384xf32>
    %43 = arith.select %39, %36, %42 : vector<32x384xi1>, vector<32x384xf32>
    %44 = math.sqrt %41 : vector<32x384xf32>
    %45 = math.sqrt %43 : vector<32x384xf32>
    %cst_34 = arith.constant dense<0.000000e+00> : vector<384xf32>
    %46 = vector.multi_reduction <add>, %41, %cst_34 [0] : vector<32x384xf32> to vector<384xf32>
    %47 = vector.shape_cast %46 : vector<384xf32> to vector<1x384xf32>
    %cst_35 = arith.constant dense<0.000000e+00> : vector<384xf32>
    %48 = vector.multi_reduction <add>, %43, %cst_35 [0] : vector<32x384xf32> to vector<384xf32>
    %49 = vector.shape_cast %48 : vector<384xf32> to vector<1x384xf32>
    %50 = vector.shape_cast %47 : vector<1x384xf32> to vector<1x1x384xf32>
    %cst_36 = arith.constant dense<0.000000e+00> : vector<1xf32>
    %51 = vector.multi_reduction <add>, %50, %cst_36 [1, 2] : vector<1x1x384xf32> to vector<1xf32>
    %52 = vector.shape_cast %51 : vector<1xf32> to vector<1x1x1xf32>
    %53 = vector.extract %52[0, 0, 0] : f32 from vector<1x1x1xf32>
    %54 = vector.broadcast %53 : f32 to vector<1x1xf32>
    %55 = math.sqrt %54 : vector<1x1xf32>
    %56 = vector.shape_cast %49 : vector<1x384xf32> to vector<1x1x384xf32>
    %cst_37 = arith.constant dense<0.000000e+00> : vector<1xf32>
    %57 = vector.multi_reduction <add>, %56, %cst_37 [1, 2] : vector<1x1x384xf32> to vector<1xf32>
    %58 = vector.shape_cast %57 : vector<1xf32> to vector<1x1x1xf32>
    %59 = vector.extract %58[0, 0, 0] : f32 from vector<1x1x1xf32>
    %60 = vector.broadcast %59 : f32 to vector<1x1xf32>
    %61 = math.sqrt %60 : vector<1x1xf32>
    %cst_38 = arith.constant 9.99999993E-9 : f32
    %62 = vector.broadcast %cst_38 : f32 to vector<1x1xf32>
    %63 = arith.addf %55, %62 : vector<1x1xf32>
    %64 = tpu.reciprocal %63 : vector<1x1xf32> -> vector<1x1xf32>
    %cst_39 = arith.constant 9.99999993E-9 : f32
    %65 = vector.broadcast %cst_39 : f32 to vector<1x1xf32>
    %66 = arith.addf %61, %65 : vector<1x1xf32>
    %67 = tpu.reciprocal %66 : vector<1x1xf32> -> vector<1x1xf32>
    %68 = vector.broadcast %64 : vector<1x1xf32> to vector<32x384xf32>
    %69 = arith.mulf %44, %68 : vector<32x384xf32>
    %70 = vector.broadcast %67 : vector<1x1xf32> to vector<32x384xf32>
    %71 = arith.mulf %45, %70 : vector<32x384xf32>
    %72 = arith.subf %69, %71 : vector<32x384xf32>
    %73 = math.absf %72 : vector<32x384xf32>
    %74 = arith.subf %44, %45 : vector<32x384xf32>
    %cst_40 = arith.constant dense<0.000000e+00> : vector<384xf32>
    %75 = vector.multi_reduction <add>, %73, %cst_40 [0] : vector<32x384xf32> to vector<384xf32>
    %76 = vector.shape_cast %75 : vector<384xf32> to vector<1x384xf32>
    %c0_41 = arith.constant 0 : index
    %c0_42 = arith.constant 0 : index
    %c0_43 = arith.constant 0 : index
    %77 = vector.load %arg3[%c0_41, %c0_42, %c0_43] : memref<1x8x384xf32, #tpu.memory_space<vmem>>, vector<1x1x384xf32>
    %78 = vector.shape_cast %77 : vector<1x1x384xf32> to vector<1x384xf32>
    %79 = vector.shape_cast %76 : vector<1x384xf32> to vector<1x1x384xf32>
    tpu.vector_store %arg3[%c0_41, %c0_42, %c0_43], %79 {strides = array<i32>} : memref<1x8x384xf32, #tpu.memory_space<vmem>>, vector<1x1x384xf32>,
    %80 = arith.mulf %74, %74 : vector<32x384xf32>
    %cst_44 = arith.constant dense<0.000000e+00> : vector<384xf32>
    %81 = vector.multi_reduction <add>, %80, %cst_44 [0] : vector<32x384xf32> to vector<384xf32>
    %82 = vector.shape_cast %81 : vector<384xf32> to vector<1x384xf32>
    %c0_45 = arith.constant 0 : index
    %c1_46 = arith.constant 1 : index
    %c0_47 = arith.constant 0 : index
    %83 = vector.load %arg3[%c0_45, %c1_46, %c0_47] : memref<1x8x384xf32, #tpu.memory_space<vmem>>, vector<1x1x384xf32>
    %84 = vector.shape_cast %83 : vector<1x1x384xf32> to vector<1x384xf32>
    %85 = vector.shape_cast %82 : vector<1x384xf32> to vector<1x1x384xf32>
    tpu.vector_store %arg3[%c0_45, %c1_46, %c0_47], %85 {strides = array<i32>} : memref<1x8x384xf32, #tpu.memory_space<vmem>>, vector<1x1x384xf32>,
    %c0_48 = arith.constant 0 : index
    %c2_49 = arith.constant 2 : index
    %c0_50 = arith.constant 0 : index
    %86 = vector.load %arg3[%c0_48, %c2_49, %c0_50] : memref<1x8x384xf32, #tpu.memory_space<vmem>>, vector<1x1x384xf32>
    %87 = vector.shape_cast %86 : vector<1x1x384xf32> to vector<1x384xf32>
    %88 = vector.shape_cast %49 : vector<1x384xf32> to vector<1x1x384xf32>
    tpu.vector_store %arg3[%c0_48, %c2_49, %c0_50], %88 {strides = array<i32>} : memref<1x8x384xf32, #tpu.memory_space<vmem>>, vector<1x1x384xf32>,
    %cst_51 = arith.constant 0.000000e+00 : f32
    %89 = vector.broadcast %cst_51 : f32 to vector<5x384xf32>
    %c0_52 = arith.constant 0 : index
    %c3_53 = arith.constant 3 : index
    %c0_54 = arith.constant 0 : index
    %90 = vector.load %arg3[%c0_52, %c3_53, %c0_54] : memref<1x8x384xf32, #tpu.memory_space<vmem>>, vector<1x5x384xf32>
    %91 = vector.shape_cast %90 : vector<1x5x384xf32> to vector<5x384xf32>
    %92 = vector.shape_cast %89 : vector<5x384xf32> to vector<1x5x384xf32>
    tpu.vector_store %arg3[%c0_52, %c3_53, %c0_54], %92 {strides = array<i32>} : memref<1x8x384xf32, #tpu.memory_space<vmem>>, vector<1x5x384xf32>,
    return
  }
  func.func @transform_0(%arg0: i32) -> (i32, i32, i32) {
    %c0_i32 = arith.constant 0 : i32
    %c0_i32_0 = arith.constant 0 : i32
    %c0_i32_1 = arith.constant 0 : i32
    return %arg0, %c0_i32, %c0_i32_0 : i32, i32, i32
  }
  func.func @transform_1(%arg0: i32) -> (i32, i32) {
    %c0_i32 = arith.constant 0 : i32
    %c0_i32_0 = arith.constant 0 : i32
    %c0_i32_1 = arith.constant 0 : i32
    return %c0_i32, %c0_i32_0 : i32, i32
  }
  func.func @transform_2(%arg0: i32) -> (i32, i32, i32) {
    %c0_i32 = arith.constant 0 : i32
    %c0_i32_0 = arith.constant 0 : i32
    %c0_i32_1 = arith.constant 0 : i32
    return %arg0, %c0_i32, %c0_i32_0 : i32, i32, i32
  }
}

</mosaic_0001>

<bundles_post_ra>
// kernel: tpu_custom_call.1
= control target key start
LH: loop header
LB: loop body
LE: loop exit
PB: predicated region body
PF: predicated region fallthrough
CT: control target
= control target key end

     0   :  { %7 = vsyncpa [#allocation4], 0  ;;  %s4499_s0 = inlined_call_operand.hbm [shape: bf16[2,96,128], index: 0, kind: input, shape index: {}]   ;;  %s4500_s1 = inlined_call_operand.hbm [shape: bf16[512,768], index: 1, kind: input, shape index: {}]   ;;  %s4501_s2 = inlined_call_operand.hbm [shape: f32[2,8,384], index: 2, kind: output, shape index: {}]  }
   0x1   :  { %9 = vsyncpa [#allocation4 + $0x1], 0 }
   0x2   :  { %10 = vsyncpa [#allocation7], 0 }
   0x3   :  { %11 = vsyncpa [#allocation5], 0 }
   0x4   :  { %13 = vsyncpa [#allocation5 + $0x1], 0  ;;  %s3681_s9 = smov 0   ;;  %s3683_s10 = smov 0  }
   0x5   :  { %s3685_s11 = smov 0   ;;  %s3687_s12 = smov 0  }
   0x6 LB: > { %s3702_s13 = sadd.s32 4294967295, %s3655_s12   ;;  %s2879_s14 = sadd.s32 4294967294, %s3655_s12   ;;  %s3655_s12 = sphi %s3687_s12, %s4531_s12   ;;  %s3651_s11 = sphi %s3685_s11, %s4530_s11   ;;  %s3647_s10 = sphi %s3683_s10, %s4529_s10   ;;  %s3643_s9 = sphi %s3681_s9, %s4528_s9  }
   0x7   : > { %p39_p0 = scmp.ne.s32.totalorder %s3647_s10, %s3643_s9  ;;  %p4502_p1 = scmp.eq.s32.totalorder %s3702_s13, 0 }
   0x8   : > { %p90_p3 = scmp.eq.s32.totalorder %s2879_s14, 1  ;;  %p2880_p5 = scmp.ge.s32.totalorder %s3655_s12, 1 }
   0x9   : > { %p3711_p4 = por %p4502_p1, %p39_p0  ;;  %p97_p7 = scmp.lt.s32.totalorder %s3655_s12, 3 }
   0xa   : > { %p3716_p6 = por %p90_p3, %p39_p0  ;;  %s3657_s18 = smov [#allocation6]  }
   0xb   : > { %s4506_s15 = scalar_select %p3711_p4, 1, 0 }
   0xc   : > { %s4507_s16 = scalar_select %p3716_p6, 1, 0 }
   0xd   : > { %p3721_p8 = pnand %p2880_p5, %p97_p7  ;;  %s109_s19 = sshll.u32 %s3657_s18, 4  ;;  %s110_s19 = int_to_ptr.vmem [resolvable:$true] %s109_s19 }
   0xe   : > { %s3735_s21 = sadd.s32 1, %s3655_s12   ;;  %s26_s22 = sadd.s32 1, %s3651_s11 }
   0xf   : > { %s4508_s17 = scalar_select %p3721_p8, 1, 0 }
  0x10   : > { %p3118_p9 = pneg %p3721_p8  ;;  %s23_s23 = ssub.s32 %s3655_s12, %s3735_s21 }
  0x11   : > { %s3544_s24 = scalar_lea.vmem %s110_s19, 24576  ;;  %p3552_p5 = scmp.lt.s32.totalorder %s110_s19, %s110_s19 }
  0x12   : > { %p3730_p11 = pnand %p3118_p9, %p4502_p1  ;;  %p3545_p13 = scmp.ne.s32.totalorder %s110_s19, %s3544_s24 }
  0x13   : > { %p3553_p7 = scmp.lt.s32.totalorder %s3544_s24, %s3544_s24 }
  0x14   : > { %p3535_p12 = pneg %p3730_p11 }
  0x15   : > { %p3554_p10 = por %p3553_p7, %p3552_p5 }
  0x16   : > { %p3547_p0 = pnand %p3545_p13, %p3535_p12 }
  0x18   : > { %p3548_p3 = pneg %p3547_p0 }
  0x1a   : > { %p3555_p2 = pnand %p3554_p10, %p3548_p3 }
  0x1c   : > { %3558 = shalt.err (!%p3555_p2)
}
  0x1d   : > { %s3658_s25 = smov 384   ;;  %s3659_s26 = smov 24  }
  0x1e   : > { %3121 = dma.hbm_to_vmem [thread:$0]  (!%p3730_p11), %s4500_s1, 24576, %s110_s19, [#allocation7], %s3658_s25, %s3658_s25, %s3659_s26  }
  0x1f   : > { %p24_p9 = scmp.eq.s32.totalorder %s23_s23, 0  ;;  %p33_p12 = scmp.ne.s32.totalorder %s3651_s11, %s3647_s10 }
  0x20   : > { %p34_p10 = scmp.eq.s32.totalorder %s3655_s12, 0  ;;  %p3131_p2 = scmp.lt.s32.totalorder %s3655_s12, 2 }
  0x21   : > { %s3752_s29 = scalar_select %p24_p9, %s3651_s11, %s26_s22  }
  0x22   : > { %p35_p13 = por %p34_p10, %p33_p12  ;;  %p4510_p0 = scmp.eq.s32.totalorder %s3702_s13, 1 }
  0x23   : > { %s123_s3 = sand.u32 1, %s3651_s11   ;;  %s3102_s4 = smul.u32 768, %s3655_s12 }
  0x24   : > { %p3756_p3 = por %p4510_p0, %p33_p12  ;;  %s3101_s5 = smul.u32 48, %s123_s3 }
  0x25   : > { %s3765_s8 = scalar_lea.hbm %s4499_s0, %s3102_s4  ;;  %p3767_p11 = pnand %p3131_p2, %p35_p13 }
  0x26   : > { %s4511_s30 = scalar_select %p3756_p3, 1, 0 }
  0x27   : > { %s127_s18 = scalar_lea.vmem [#allocation3], %s3101_s5  ;;  %s3773_s20 = scalar_lea.sflag [#allocation4], %s123_s3 }
  0x28   : > { %s134_s19 = sshll.u32 %s127_s18, 4  ;;  %s3559_s22 = scalar_lea.hbm %s3765_s8, 768  ;;  %s3771_s19 = int_to_ptr.vmem [resolvable:$true] %s134_s19 }
  0x29   : > { %p3560_p5 = scmp.ne.s32.totalorder %s3765_s8, %s3559_s22  ;;  %p3561_p7 = pneg %p3767_p11 }
  0x2a   : > { %s3564_s25 = scalar_lea.hbm %s4499_s0, 1536  ;;  %p3565_p10 = scmp.lt.s32.totalorder %s3765_s8, %s4499_s0 }
  0x2b   : > { %p3562_p9 = pnand %p3561_p7, %p3560_p5  ;;  %p3566_p2 = scmp.lt.s32.totalorder %s3564_s25, %s3559_s22 }
  0x2d   : > { %p3563_p12 = pneg %p3562_p9  ;;  %p3567_p13 = por %p3566_p2, %p3565_p10 }
  0x2f   : > { %p3568_p0 = pnand %p3567_p13, %p3563_p12 }
  0x31   : > { %3571 = shalt.err (!%p3568_p0)
}
  0x32   : > { %s3572_s28 = scalar_lea.vmem %s3771_s19, 768  ;;  %s3660_s3 = smov [#allocation3]  }
  0x33   : > { %p3573_p1 = scmp.ne.s32.totalorder %s3771_s19, %s3572_s28  ;;  %s3577_s4 = sshll.u32 %s3660_s3, 4  ;;  %s3578_s4 = int_to_ptr.vmem [resolvable:$false] %s3577_s4 }
  0x34   : > { %s3579_s5 = scalar_lea.vmem %s3578_s4, 1536  ;;  %p3580_p9 = scmp.lt.s32.totalorder %s3771_s19, %s3578_s4 }
  0x35   : > { %p3575_p6 = pnand %p3573_p1, %p3561_p7  ;;  %p3581_p3 = scmp.lt.s32.totalorder %s3579_s5, %s3572_s28 }
  0x37   : > { %p3576_p5 = pneg %p3575_p6  ;;  %p3582_p4 = por %p3581_p3, %p3580_p9 }
  0x39   : > { %p3583_p8 = pnand %p3582_p4, %p3576_p5 }
  0x3b   : > { %3586 = shalt.err (!%p3583_p8)
}
  0x3c   : > { %s3661_s6 = smov 64   ;;  %s3662_s7 = smov 4  }
  0x3d   : > { %3125 = dma.hbm_to_vmem [thread:$0]  (!%p3767_p11), %s3765_s8, 768, %s3771_s19, %s3773_s20, %s3661_s6, %s3661_s6, %s3662_s7  }
  0x3e   : > { %p4513_p1 = scmp.ne.s32.totalorder %s4508_s17, 0 }
  0x3f   : > { %s3797_s18 = sand.u32 (!%p4513_p1), 1, %s3647_s10   ;;  %p4514_p4 = scmp.ne.s32.totalorder (!%p4513_p1), %s4506_s15, 0 }
  0x40   : > { %146 = sbr.rel (%p4513_p1) target bundleno = 801 (0x321), region = 28  ;;  %s149_s23 = scalar_lea.sflag (!%p4513_p1), [#allocation4], %s3797_s18 }
  0x41   : > { %s3103_s22 = smul.u32 (!%p4513_p1), 48, %s3797_s18 }
  0x43   : > { %s3801_s24 = scalar_lea.vmem (!%p4513_p1), [#allocation3], %s3103_s22 }
  0x45   : > { %3630 = dma.done.wait (%p4514_p4), %s149_s23, 768  }
  0x46   : > { %3632 = vsyncadd (%p4514_p4), %s149_s23, 4294966528  ;;  %p4515_p6 = scmp.eq.s32.totalorder %s3702_s13, 0 }
  0x48   : > { %3634 = dma.done.wait (%p4515_p6), [#allocation7], 24576   ;;  %p4516_p8 = pmov %p4515_p6 }
  0x49   : > { %v3173_v0 = vld [vmem:[#allocation6 + $0x154] ss:$24 sps:$4 sm:$0xff]   ;;  %v3177_v2 = vld [vmem:[#allocation6 + $0x150] ss:$24 sps:$4 sm:$0xff]   ;;  %v3179_v4 = vld [vmem:[#allocation6 + $0x124] ss:$24 sps:$4 sm:$0xff]  }
  0x4a   : > { %3636 = vsyncadd (%p4516_p8), [#allocation7], 4294942720  ;;  %v3175_v1 = vld [vmem:[#allocation6 + $0x454] ss:$24 sps:$4 sm:$0xff]   ;;  %1748 = vmatprep.subr.bf16.mxu0 %v3173_v0  ;;  %v3178_v3 = vld [vmem:[#allocation6 + $0x450] ss:$24 sps:$4 sm:$0xff]  }
  0x4b   : > { %1821 = vmatprep.subr.bf16.mxu1 %v3175_v1  ;;  %1749 = vmatpush1.bf16.msra.mxu0 %v3177_v2  ;;  %v3181_v5 = vld [vmem:[#allocation6 + $0x424] ss:$24 sps:$4 sm:$0xff]   ;;  %v3183_v6 = vld [vmem:[#allocation6 + $0x120] ss:$24 sps:$4 sm:$0xff]   ;;  %v3185_v8 = vld [vmem:[#allocation6 + $0xf4] ss:$24 sps:$4 sm:$0xff]  }
  0x4c   : > { %1822 = vmatpush1.bf16.msra.mxu1 %v3178_v3  ;;  %1750 = vmatprep.subr.bf16.mxu0 %v3179_v4  ;;  %v3184_v7 = vld [vmem:[#allocation6 + $0x420] ss:$24 sps:$4 sm:$0xff]   ;;  %v3187_v9 = vld [vmem:[#allocation6 + $0x3f4] ss:$24 sps:$4 sm:$0xff]   ;;  %v3189_v10 = vld [vmem:[#allocation6 + $0xf0] ss:$24 sps:$4 sm:$0xff]  }
  0x4d   : > { %1823 = vmatprep.subr.bf16.mxu1 %v3181_v5  ;;  %v3190_v11 = vld [vmem:[#allocation6 + $0x3f0] ss:$24 sps:$4 sm:$0xff]   ;;  %v3191_v12 = vld [vmem:[#allocation6 + $0xc4] ss:$24 sps:$4 sm:$0xff]   ;;  %v3195_v14 = vld [vmem:[#allocation6 + $0xc0] ss:$24 sps:$4 sm:$0xff]  }
  0x4e   : > { %v3193_v13 = vld [vmem:[#allocation6 + $0x3c4] ss:$24 sps:$4 sm:$0xff]   ;;  %v3196_v15 = vld [vmem:[#allocation6 + $0x3c0] ss:$24 sps:$4 sm:$0xff]   ;;  %v3197_v16 = vld [vmem:[#allocation6 + $0x94] ss:$24 sps:$4 sm:$0xff]  }
  0x4f   : > { %1751 = vmatpush1.bf16.msra.mxu0 %v3183_v6  ;;  %v3199_v17 = vld [vmem:[#allocation6 + $0x394] ss:$24 sps:$4 sm:$0xff]   ;;  %v3201_v18 = vld [vmem:[#allocation6 + $0x90] ss:$24 sps:$4 sm:$0xff]   ;;  %v3203_v20 = vld [vmem:[#allocation6 + $0x64] ss:$24 sps:$4 sm:$0xff]  }
  0x50   : > { %1824 = vmatpush1.bf16.msra.mxu1 %v3184_v7  ;;  %1752 = vmatprep.subr.bf16.mxu0 %v3185_v8  ;;  %v3202_v19 = vld [vmem:[#allocation6 + $0x390] ss:$24 sps:$4 sm:$0xff]   ;;  %v3205_v21 = vld [vmem:[#allocation6 + $0x364] ss:$24 sps:$4 sm:$0xff]   ;;  %v3207_v22 = vld [vmem:[#allocation6 + $0x60] ss:$24 sps:$4 sm:$0xff]  }
  0x51   : > { %1825 = vmatprep.subr.bf16.mxu1 %v3187_v9  ;;  %v3208_v23 = vld [vmem:[#allocation6 + $0x360] ss:$24 sps:$4 sm:$0xff]   ;;  %v3209_v24 = vld [vmem:[#allocation6 + $0x34] ss:$24 sps:$4 sm:$0xff]   ;;  %v3213_v26 = vld [vmem:[#allocation6 + $0x30] ss:$24 sps:$4 sm:$0xff]  }
  0x52   : > { %v3211_v25 = vld [vmem:[#allocation6 + $0x334] ss:$24 sps:$4 sm:$0xff]   ;;  %v3214_v27 = vld [vmem:[#allocation6 + $0x330] ss:$24 sps:$4 sm:$0xff]   ;;  %v3215_v28 = vld [vmem:[#allocation6 + $0x4] ss:$24 sps:$4 sm:$0xff]  }
  0x53   : > { %1753 = vmatpush1.bf16.msra.mxu0 %v3189_v10  ;;  %v3217_v29 = vld [vmem:[#allocation6 + $0x304] ss:$24 sps:$4 sm:$0xff]   ;;  %v3219_v30 = vld [vmem:[#allocation6] ss:$24 sps:$4 sm:$0xff]   ;;  %v3221_v32 = vld [vmem:[#allocation6 + $0x2d4] ss:$24 sps:$4 sm:$0xff]  }
  0x54   : > { %1826 = vmatpush1.bf16.msra.mxu1 %v3190_v11  ;;  %1754 = vmatprep.subr.bf16.mxu0 %v3191_v12  ;;  %v3220_v31 = vld [vmem:[#allocation6 + $0x300] ss:$24 sps:$4 sm:$0xff]   ;;  %v3223_v33 = vld [vmem:[#allocation6 + $0x5d4] ss:$24 sps:$4 sm:$0xff]   ;;  %v3225_v34 = vld [vmem:[#allocation6 + $0x2d0] ss:$24 sps:$4 sm:$0xff]  }
  0x55   : > { %1827 = vmatprep.subr.bf16.mxu1 %v3193_v13  ;;  %v3226_v35 = vld [vmem:[#allocation6 + $0x5d0] ss:$24 sps:$4 sm:$0xff]   ;;  %v3227_v36 = vld [vmem:[#allocation6 + $0x2a4] ss:$24 sps:$4 sm:$0xff]   ;;  %v3231_v38 = vld [vmem:[#allocation6 + $0x2a0] ss:$24 sps:$4 sm:$0xff]  }
  0x56   : > { %v3229_v37 = vld [vmem:[#allocation6 + $0x5a4] ss:$24 sps:$4 sm:$0xff]   ;;  %v3232_v39 = vld [vmem:[#allocation6 + $0x5a0] ss:$24 sps:$4 sm:$0xff]   ;;  %v3233_v40 = vld [vmem:[#allocation6 + $0x274] ss:$24 sps:$4 sm:$0xff]  }
  0x57   : > { %1755 = vmatpush1.bf16.msra.mxu0 %v3195_v14  ;;  %v3235_v41 = vld [vmem:[#allocation6 + $0x574] ss:$24 sps:$4 sm:$0xff]   ;;  %vm198_vm0 = vsmask.f32 3328  ;;  %vm199_vm1 = vsmask.f32 7440 }
  0x58   : > { %1828 = vmatpush1.bf16.msra.mxu1 %v3196_v15  ;;  %1756 = vmatprep.subr.bf16.mxu0 %v3197_v16  ;;  %v3237_v42 = vld [vmem:[#allocation6 + $0x270] ss:$24 sps:$4 sm:$0xff]   ;;  %vm320_vm2 = vcmask 1042432   ;;  %vm321_vm3 = vcmask 1046532   ;;  %v3239_v44 = vld [vmem:[#allocation6 + $0x244] ss:$24 sps:$4 sm:$0xff]   ;;  %vm3836_vm7 = vmor %vm198_vm0, %vm199_vm1 }
  0x59   : > { %1829 = vmatprep.subr.bf16.mxu1 %v3199_v17  ;;  %v3238_v43 = vld [vmem:[#allocation6 + $0x570] ss:$24 sps:$4 sm:$0xff]   ;;  %vm380_vm4 = vsmask.f32 2304  ;;  %v3241_v45 = vld [vmem:[#allocation6 + $0x544] ss:$24 sps:$4 sm:$0xff]   ;;  %vm3826_vm6 = vmor %vm320_vm2, %vm321_vm3 }
  0x5a   : > { %vm381_vm5 = vsmask.f32 6416  ;;  %v3243_v46 = vld [vmem:[#allocation6 + $0x240] ss:$24 sps:$4 sm:$0xff]   ;;  %v3245_v49 = vld [vmem:[#allocation6 + $0x214] ss:$24 sps:$4 sm:$0xff]  }
  0x5b   : > { %1757 = vmatpush1.bf16.msra.mxu0 %v3201_v18  ;;  %v3244_v47 = vld [vmem:[#allocation6 + $0x540] ss:$24 sps:$4 sm:$0xff]   ;;  %v3247_v50 = vld [vmem:[#allocation6 + $0x514] ss:$24 sps:$4 sm:$0xff]   ;;  %v3249_v62 = vld [vmem:[#allocation6 + $0x210] ss:$24 sps:$4 sm:$0xff]  }
  0x5c   : > { %1830 = vmatpush1.bf16.msra.mxu1 %v3202_v19  ;;  %1758 = vmatprep.subr.bf16.mxu0 %v3203_v20  ;;  %v177_v48 = vld [vmem:[%s3801_s24] sm:$0xf]  ;;  %v178_v51 = vld [vmem:[%s3801_s24 + $0x4] sm:$0xf]  ;;  %v3816_v54 = vld [vmem:[%s3801_s24 + $0x8] sm:$0xf] }
  0x5d   : > { %1831 = vmatprep.subr.bf16.mxu1 %v3205_v21  ;;  %181 = vst [vmem:[#allocation2] sm:$0xf] %v177_v48  ;;  %v193_v52 = vld [vmem:[%s3801_s24] sm:$0xf]  ;;  %v194_v53 = vld [vmem:[%s3801_s24 + $0x4] sm:$0xf]  ;;  %vm3850_vm8 = vmor %vm380_vm4, %vm381_vm5 }
  0x5e   : > { %182 = vst [vmem:[#allocation2 + $0x10] sm:$0xf] %v178_v51  ;;  %v202_v55 = vshrl.u32 %v193_v52, 16  ;;  %v205_v56 = vshll.u32 %v193_v52, 16  ;;  %v211_v57 = vshll.u32 %v194_v53, 16  ;;  %v215_v58 = vshrl.u32 %v194_v53, 16 }
  0x5f   : > { %1759 = vmatpush1.bf16.msra.mxu0 %v3207_v22  ;;  %v221_v59 = vshll.u32 %v3816_v54, 16  ;;  %v310_v60 = vld [vmem:[%s3801_s24] sm:$0xe]  ;;  %v311_v61 = vld [vmem:[%s3801_s24 + $0x4] sm:$0xf]  ;;  %s3104_s15 = smul.u32 24, %s3797_s18 }
  0x60   : > { %1832 = vmatpush1.bf16.msra.mxu1 %v3208_v23  ;;  %1760 = vmatprep.subr.bf16.mxu0 %v3209_v24  ;;  %v3250_v63 = vld [vmem:[#allocation6 + $0x510] ss:$24 sps:$4 sm:$0xff]   ;;  %v204_v0 = vrot.slane %v202_v55, 4  ;;  %v207_v1 = vrot.slane %v205_v56, 5  ;;  %v213_v2 = vrot.slane %v211_v57, 5  ;;  %v217_v3 = vrot.slane %v215_v58, 4 }
  0x61   : > { %1833 = vmatprep.subr.bf16.mxu1 %v3211_v25  ;;  %v3822_v4 = vld [vmem:[%s3801_s24 + $0x8] sm:$0xf]  ;;  %v3251_v6 = vld [vmem:[#allocation6 + $0x1e4] ss:$24 sps:$4 sm:$0xff]   ;;  %v3830_v8 = vrot.slane %v221_v59, 5  ;;  %v2886_v9 = vrot.slane %v310_v60, 9 }
  0x62   : > { %v3253_v7 = vld [vmem:[#allocation6 + $0x4e4] ss:$24 sps:$4 sm:$0xff]   ;;  %v325_v10 = vrot.slane %v311_v61, 5  ;;  %v328_v11 = vrot.slane %v3822_v4, 5  ;;  %v375_v12 = vld [vmem:[%s3801_s24] sm:$0xe]  ;;  %v208_v14 = vor.u32 %v207_v1, %v204_v0  ;;  %v218_v15 = vor.u32 %v217_v3, %v213_v2 }
  0x63   : > { %1761 = vmatpush1.bf16.msra.mxu0 %v3213_v26  ;;  %v376_v16 = vld [vmem:[%s3801_s24 + $0x4] sm:$0xf]  ;;  %v377_v17 = vld [vmem:[%s3801_s24 + $0x8] sm:$0xf]  ;;  %v384_v18 = vshrl.u32 %v375_v12, 16  ;;  %v387_v19 = vshll.u32 %v375_v12, 16 }
  0x64   : > { %1834 = vmatpush1.bf16.msra.mxu1 %v3214_v27  ;;  %1762 = vmatprep.subr.bf16.mxu0 %v3215_v28  ;;  %v326_v20 = vsel %vm3826_vm6, %v2886_v9, %v325_v10  ;;  %v327_v21 = vrot.slane %v325_v10, 4  ;;  %v393_v22 = vshrl.u32 %v376_v16, 16  ;;  %v396_v23 = vshll.u32 %v376_v16, 16  ;;  %v3265_v51 = vld [vmem:[#allocation6 + $0x484] ss:$24 sps:$4 sm:$0xff]   ;;  %s4425_s17 = scalar_lea.vmem [#allocation8], %s3104_s15 }
  0x65   : > { %1835 = vmatprep.subr.bf16.mxu1 %v3217_v29  ;;  %v209_v24 = vrot.slane %v208_v14, 4  ;;  %v219_v25 = vrot.slane %v218_v15, 4  ;;  %340 = vst [vmem:[#allocation2 + $0x8] sm:$0xf] %v326_v20  ;;  %v386_v26 = vrot.slane %v384_v18, 5  ;;  %v389_v27 = vrot.slane %v387_v19, 6 }
  0x66   : > { %v329_v28 = vsel %vm3826_vm6, %v327_v21, %v328_v11  ;;  %v3267_v52 = vld [vmem:[#allocation6 + $0x180] ss:$24 sps:$4 sm:$0xff]   ;;  %v3277_v57 = vld [vmem:[#allocation6 + $0x15c] ss:$24 sps:$4 sm:$0xff]   ;;  %v225_v59 = vshrl.u32 %v3816_v54, 16  ;;  %s3109_s19 = smul.u32 384, %s3702_s13 }
  0x67   : > { %1763 = vmatpush1.bf16.msra.mxu0 %v3219_v30  ;;  %v395_v30 = vrot.slane %v393_v22, 5  ;;  %341 = vst [vmem:[#allocation2 + $0x18] sm:$0xf] %v329_v28  ;;  %v3268_v55 = vld [vmem:[#allocation6 + $0x480] ss:$24 sps:$4 sm:$0xff]   ;;  %s2799_s20 = sshll.u32 %s4425_s17, 4  ;;  %s2800_s20 = int_to_ptr.vmem [resolvable:$true] %s2799_s20 }
  0x68   : > { %1836 = vmatpush1.bf16.msra.mxu1 %v3220_v31  ;;  %1764 = vmatprep.subr.bf16.mxu0 %v3221_v32  ;;  %v398_v31 = vrot.slane %v396_v23, 6  ;;  %v403_v32 = vshrl.u32 %v377_v17, 16  ;;  %v3280_v58 = vld [vmem:[#allocation6 + $0x45c] ss:$24 sps:$4 sm:$0xff]   ;;  %v3870_v60 = vld [vmem:[#allocation2] ss:$16 sps:$4 sm:$0xff]   ;;  %s2797_s27 = scalar_lea.hbm %s4501_s2, %s3109_s19 }
  0x69   : > { %1837 = vmatprep.subr.bf16.mxu1 %v3223_v33  ;;  %v3255_v33 = vld [vmem:[#allocation6 + $0x1e0] ss:$24 sps:$4 sm:$0xff]   ;;  %v227_v3 = vrot.slane %v225_v59, 4  ;;  %v3292_v9 = vld [vmem:[#allocation6 + $0x3fc] ss:$24 sps:$4 sm:$0xff]   ;;  %s2785_s28 = scalar_lea.sflag [#allocation5], %s3797_s18 }
  0x6a   : > { %v3275_v61 = vld [vmem:[#allocation6 + $0x158] ss:$24 sps:$4 sm:$0xff]   ;;  %v3281_v54 = vld [vmem:[#allocation6 + $0x128] ss:$24 sps:$4 sm:$0xff]   ;;  %v3295_v15 = vld [vmem:[#allocation6 + $0xcc] ss:$24 sps:$4 sm:$0xff]  }
  0x6b   : > { %1765 = vmatpush2.bf16.msra.mxu0 %v3225_v34  ;;  %v3256_v34 = vld [vmem:[#allocation6 + $0x4e0] ss:$24 sps:$4 sm:$0xff]   ;;  %v228_v10 = vor.u32 %v227_v3, %v3830_v8  ;;  %v3298_v18 = vld [vmem:[#allocation6 + $0x3cc] ss:$24 sps:$4 sm:$0xff]   ;;  %v3301_v21 = vld [vmem:[#allocation6 + $0x9c] ss:$24 sps:$4 sm:$0xff]  }
  0x6c   : > { %1838 = vmatpush2.bf16.msra.mxu1 %v3226_v35  ;;  %1766 = vmatprep.subr.bf16.mxu0 %v3227_v36  ;;  %v214_v35 = vsel %vm3836_vm7, %v209_v24, %v213_v2  ;;  %v224_v36 = vsel %vm3836_vm7, %v219_v25, %v3830_v8  ;;  %v3286_v2 = vld [vmem:[#allocation6 + $0x42c] ss:$24 sps:$4 sm:$0xff]   ;;  %v3287_v12 = vld [vmem:[#allocation6 + $0xf8] ss:$24 sps:$4 sm:$0xff]   ;;  %v3293_v16 = vld [vmem:[#allocation6 + $0xc8] ss:$24 sps:$4 sm:$0xff]  }
  0x6d   : > { %1839 = vmatprep.subr.bf16.mxu1 %v3229_v37  ;;  %v390_v37 = vor.u32 %v389_v27, %v386_v26  ;;  %249 = vst [vmem:[#allocation2 + $0x4] sm:$0xf] %v214_v35  ;;  %250 = vst [vmem:[#allocation2 + $0x14] sm:$0xf] %v224_v36  ;;  %v3290_v14 = vld [vmem:[#allocation6 + $0x3f8] ss:$24 sps:$4 sm:$0xff]  }
  0x6e   : > { %v3874_v1 = vld [vmem:[#allocation2 + $0x8] ss:$16 sps:$4 sm:$0xff]   ;;  %v229_v19 = vrot.slane %v228_v10, 4  ;;  %v3304_v23 = vld [vmem:[#allocation6 + $0x39c] ss:$24 sps:$4 sm:$0xff]   ;;  %s3587_s3 = scalar_lea.vmem %s2800_s20, 384 }
  0x6f   : > { %1767 = vmatpush2.bf16.msra.mxu0 %v3231_v38  ;;  %v406_v38 = vshll.u32 %v377_v17, 16  ;;  %v330_v17 = vrot.slane %v328_v11, 4  ;;  %v3296_v8 = vld [vmem:[#allocation6 + $0x3c8] ss:$24 sps:$4 sm:$0xff]   ;;  %v180_v24 = vld [vmem:[%s3801_s24 + $0xc] sm:$0xf]  ;;  %p3588_p3 = scmp.ne.s32.totalorder %s2800_s20, %s3587_s3 }
  0x70   : > { %1840 = vmatpush2.bf16.msra.mxu1 %v3232_v39  ;;  %1768 = vmatprep.subr.bf16.mxu0 %v3233_v40  ;;  %v3257_v39 = vld [vmem:[#allocation6 + $0x1b4] ss:$24 sps:$4 sm:$0xff]   ;;  %v179_v22 = vld [vmem:[%s3801_s24 + $0x8] sm:$0xf]  ;;  %v197_v26 = vld [vmem:[%s3801_s24 + $0x10] sm:$0x1] }
  0x71   : > { %1841 = vmatprep.subr.bf16.mxu1 %v3235_v41  ;;  %v3259_v40 = vld [vmem:[#allocation6 + $0x4b4] ss:$24 sps:$4 sm:$0xff]   ;;  %v399_v41 = vor.u32 %v398_v31, %v395_v30  ;;  %183 = vst [vmem:[#allocation2 + $0x20] sm:$0xf] %v179_v22  ;;  %v3299_v4 = vld [vmem:[#allocation6 + $0x98] ss:$24 sps:$4 sm:$0xff]  }
  0x72   : > { %v196_v25 = vld [vmem:[%s3801_s24 + $0xc] sm:$0xf]  ;;  %184 = vst [vmem:[#allocation2 + $0x30] sm:$0xf] %v180_v24  ;;  %v241_v28 = vshll.u32 %v197_v26, 16  ;;  %p4525_p11 = scmp.ne.s32.totalorder %s4511_s30, 0 }
  0x73   : > { %1769 = vmatpush2.bf16.msra.mxu0 %v3237_v42  ;;  %v405_v42 = vrot.slane %v403_v32, 5  ;;  %v231_v11 = vshll.u32 %v196_v25, 16  ;;  %v235_v27 = vshrl.u32 %v196_v25, 16  ;;  %v313_v30 = vld [vmem:[%s3801_s24 + $0xc] sm:$0xf]  ;;  %s3665_s4 = smov [#allocation8]  }
  0x74   : > { %1842 = vmatpush2.bf16.msra.mxu1 %v3238_v43  ;;  %1770 = vmatprep.subr.bf16.mxu0 %v3239_v44  ;;  %v391_v43 = vrot.slane %v390_v37, 4  ;;  %v408_v44 = vrot.slane %v406_v38, 6  ;;  %v3866_v56 = vld [vmem:[#allocation2 + $0x4] ss:$16 sps:$4 sm:$0xff]   ;;  %v314_v31 = vld [vmem:[%s3801_s24 + $0x10] sm:$0x1]  ;;  %p3589_p7 = pnand %p3588_p3, %p4525_p11 }
  0x75   : > { %1843 = vmatprep.subr.bf16.mxu1 %v3241_v45  ;;  %v401_v45 = vrot.slane %v399_v41, 4  ;;  %1780 = vmatprep.mubr.bf16.mxu0 %v3866_v56  ;;  %v331_v32 = vrot.slane %v313_v30, 5  ;;  %v237_v35 = vrot.slane %v235_v27, 4  ;;  %v243_v36 = vrot.slane %v241_v28, 5  ;;  %v379_v38 = vld [vmem:[%s3801_s24 + $0x10] sm:$0x3] }
  0x76   : > { %v400_v48 = vsel %vm3850_vm8, %v391_v43, %v399_v41  ;;  %v334_v37 = vrot.slane %v314_v31, 5  ;;  %v3316_v3 = vld [vmem:[#allocation6 + $0x33c] ss:$24 sps:$4 sm:$0xff]   ;;  %v344_v24 = vld [vmem:[%s3801_s24 + $0x18] sm:$0xe]  ;;  %p3590_p12 = pneg %p3589_p7  ;;  %s3591_s13 = sshll.u32 %s3665_s4, 4  ;;  %s3592_s13 = int_to_ptr.vmem [resolvable:$false] %s3591_s13 }
  0x77   : > { %1771 = vmatpush2.bf16.msra.mxu0 %v3243_v46  ;;  %v3261_v46 = vld [vmem:[#allocation6 + $0x1b0] ss:$24 sps:$4 sm:$0xff]   ;;  %435 = vst [vmem:[#allocation2 + $0xc] sm:$0xf] %v400_v48  ;;  %v333_v41 = vrot.slane %v331_v32, 4  ;;  %v426_v48 = vshll.u32 %v379_v38, 16  ;;  %p3594_p10 = scmp.lt.s32.totalorder %s2800_s20, %s3592_s13 }
  0x78   : > { %1844 = vmatpush2.bf16.msra.mxu1 %v3244_v47  ;;  %1772 = vmatprep.subr.bf16.mxu0 %v3245_v49  ;;  %v3262_v47 = vld [vmem:[#allocation6 + $0x4b0] ss:$24 sps:$4 sm:$0xff]   ;;  %v3861_v49 = vor.u32 %v408_v44, %v405_v42  ;;  %v345_v27 = vld [vmem:[%s3801_s24 + $0x1c] sm:$0xf]  ;;  %s3593_s5 = scalar_lea.vmem %s3592_s13, 768 }
  0x79   : > { %1845 = vmatprep.subr.bf16.mxu1 %v3247_v50  ;;  %v3263_v50 = vld [vmem:[#allocation6 + $0x184] ss:$24 sps:$4 sm:$0xff]   ;;  %v3302_v44 = vld [vmem:[#allocation6 + $0x398] ss:$24 sps:$4 sm:$0xff]   ;;  %v3317_v25 = vld [vmem:[#allocation6 + $0x8] ss:$24 sps:$4 sm:$0xff]   ;;  %p3595_p2 = scmp.lt.s32.totalorder %s3593_s5, %s3587_s3 }
  0x7a   : > { %v410_v53 = vsel %vm3850_vm8, %v401_v45, %v3861_v49  ;;  %v411_v20 = vrot.slane %v3861_v49, 4  ;;  %v3322_v49 = vld [vmem:[#allocation6 + $0x30c] ss:$24 sps:$4 sm:$0xff]   ;;  %v3325_v28 = vld [vmem:[#allocation6 + $0x2dc] ss:$24 sps:$4 sm:$0xff]  }
  0x7b   : > { %1773 = vmatpush2.bf16.msra.mxu0 %v3249_v62  ;;  %436 = vst [vmem:[#allocation2 + $0x1c] sm:$0xf] %v410_v53  ;;  %v3278_v62 = vld [vmem:[#allocation6 + $0x458] ss:$24 sps:$4 sm:$0xff]   ;;  %p3596_p13 = por %p3595_p2, %p3594_p10 }
  0x7c   : > { %1846 = vmatpush2.bf16.msra.mxu1 %v3250_v63  ;;  %1774 = vmatprep.subr.bf16.mxu0 %v3251_v6  ;;  %v3283_v63 = vld [vmem:[#allocation6 + $0x12c] ss:$24 sps:$4 sm:$0xff]   ;;  %v3289_v6 = vld [vmem:[#allocation6 + $0xfc] ss:$24 sps:$4 sm:$0xff]   ;;  %v3380_v29 = vld [vmem:[#allocation6 + $0x4b8] ss:$24 sps:$4 sm:$0xff]  }
  0x7d   : > { %1847 = vmatprep.subr.bf16.mxu1 %v3253_v7  ;;  %v3284_v7 = vld [vmem:[#allocation6 + $0x428] ss:$24 sps:$4 sm:$0xff]   ;;  %p3597_p0 = pnand %p3596_p13, %p3590_p12 }
  0x7f   : > { %1775 = vmatpush2.bf16.msra.mxu0 %v3255_v33  ;;  %v378_v33 = vld [vmem:[%s3801_s24 + $0xc] sm:$0xf] }
  0x80   : > { %1848 = vmatpush2.bf16.msra.mxu1 %v3256_v34  ;;  %1776 = vmatprep.subr.bf16.mxu0 %v3257_v39  ;;  %v233_v34 = vrot.slane %v231_v11, 5  ;;  %v3307_v39 = vld [vmem:[#allocation6 + $0x6c] ss:$24 sps:$4 sm:$0xff]   ;;  %v413_v42 = vshrl.u32 %v378_v33, 16  ;;  %v416_v43 = vshll.u32 %v378_v33, 16 }
  0x81   : > { %1849 = vmatprep.subr.bf16.mxu1 %v3259_v40  ;;  %v332_v40 = vsel %vm3826_vm6, %v330_v17, %v331_v32  ;;  %v254_v17 = vld [vmem:[%s3801_s24 + $0x1c] sm:$0xf]  ;;  %v3919_v33 = vld [vmem:[%s3801_s24 + $0x20] sm:$0xf] }
  0x82   : > { %v3872_v0 = vld [vmem:[#allocation2 + $0xc] ss:$16 sps:$4 sm:$0xff]   ;;  %v234_v45 = vsel %vm3836_vm7, %v229_v19, %v233_v34  ;;  %342 = vst [vmem:[#allocation2 + $0x28] sm:$0xf] %v332_v40  ;;  %v415_v53 = vrot.slane %v413_v42, 5  ;;  %v272_v22 = vshrl.u32 %v254_v17, 16 }
  0x83   : > { %1777 = vmatpush2.bf16.msra.mxu0 %v3261_v46  ;;  %1853 = vmatprep.mubr.bf16.mxu1 %v3872_v0  ;;  %v238_v46 = vor.u32 %v237_v35, %v233_v34  ;;  %251 = vst [vmem:[#allocation2 + $0x24] sm:$0xf] %v234_v45  ;;  %v2887_v34 = vrot.slane %v344_v24, 9  ;;  %v3320_v35 = vld [vmem:[#allocation6 + $0x308] ss:$24 sps:$4 sm:$0xff]  }
  0x84   : > { %1850 = vmatpush2.bf16.msra.mxu1 %v3262_v47  ;;  %1778 = vmatprep.subr.bf16.mxu0 %v3263_v50  ;;  %v423_v47 = vshrl.u32 %v379_v38, 16  ;;  %v3305_v50 = vld [vmem:[#allocation6 + $0x68] ss:$24 sps:$4 sm:$0xff]   ;;  %v274_v31 = vrot.slane %v272_v22, 4  ;;  %v359_v38 = vrot.slane %v3919_v33, 5 }
  0x85   : > { %1851 = vmatprep.subr.bf16.mxu1 %v3265_v51  ;;  %v3310_v51 = vld [vmem:[#allocation6 + $0x36c] ss:$24 sps:$4 sm:$0xff]   ;;  %v3343_v22 = vld [vmem:[#allocation6 + $0x27c] ss:$24 sps:$4 sm:$0xff]  }
  0x86   : > { %v425_v59 = vrot.slane %v423_v47, 5  ;;  %v440_v40 = vld [vmem:[%s3801_s24 + $0x1c] sm:$0xf]  ;;  %v3323_v47 = vld [vmem:[#allocation6 + $0x2d8] ss:$24 sps:$4 sm:$0xff]  }
  0x87   : > { %1779 = vmatpush2.bf16.msra.mxu0 %v3267_v52  ;;  %v335_v52 = vsel %vm3826_vm6, %v333_v41, %v334_v37  ;;  %v356_v37 = vrot.slane %v345_v27, 5  ;;  %v3328_v41 = vld [vmem:[#allocation6 + $0x5dc] ss:$24 sps:$4 sm:$0xff]  }
  0x88   : > { %1852 = vmatpush2.bf16.msra.mxu1 %v3268_v55  ;;  %1894 = vmatprep.subr.bf16.mxu0 %v3277_v57  ;;  %v418_v55 = vrot.slane %v416_v43, 6  ;;  %v3308_v57 = vld [vmem:[#allocation6 + $0x368] ss:$24 sps:$4 sm:$0xff]   ;;  %343 = vst [vmem:[#allocation2 + $0x38] sm:$0xf] %v335_v52 }
  0x89   : > { %1967 = vmatprep.subr.bf16.mxu1 %v3280_v58  ;;  %v239_v58 = vrot.slane %v238_v46, 4  ;;  %v441_v43 = vld [vmem:[%s3801_s24 + $0x20] sm:$0xf]  ;;  %v454_v46 = vshrl.u32 %v440_v40, 16  ;;  %v357_v52 = vsel %vm3826_vm6, %v2887_v34, %v356_v37  ;;  %v257_v34 = vld [vmem:[%s3801_s24 + $0x28] sm:$0x1] }
  0x8a   : > { %1781 = vmatmul.mubr.bf16.vlgmr.msra.gmra.mxu0 %v3870_v60  ;;  %371 = vst [vmem:[#allocation2 + $0x48] sm:$0xf] %v357_v52 }
  0x8b   : > { %1895 = vmatpush1.bf16.msra.mxu0 %v3275_v61  ;;  %1854 = vmatmul.mubr.bf16.vlgmr.msra.gmra.mxu1 %v3874_v1  ;;  %v428_v61 = vrot.slane %v426_v48, 6 }
  0x8c   : > { %1896 = vmatprep.subr.bf16.mxu0 %v3283_v63  ;;  %1968 = vmatpush1.bf16.msra.mxu1 %v3278_v62  ;;  %v3313_v62 = vld [vmem:[#allocation6 + $0x3c] ss:$24 sps:$4 sm:$0xff]   ;;  %v419_v63 = vor.u32 %v418_v55, %v415_v53  ;;  %v358_v55 = vrot.slane %v356_v37, 4 }
  0x8d   : > { %1969 = vmatprep.subr.bf16.mxu1 %v3286_v2  ;;  %v3311_v2 = vld [vmem:[#allocation6 + $0x38] ss:$24 sps:$4 sm:$0xff]   ;;  %v347_v37 = vld [vmem:[%s3801_s24 + $0x24] sm:$0xf] }
  0x8e   : > { %v420_v10 = vsel %vm3850_vm8, %v411_v20, %v419_v63  ;;  %v362_v33 = vrot.slane %v347_v37, 5  ;;  %v3383_v37 = vld [vmem:[#allocation6 + $0x188] ss:$24 sps:$4 sm:$0xff]  }
  0x8f   : > { %1897 = vmatpush1.bf16.msra.mxu0 %v3281_v54  ;;  %v244_v54 = vsel %vm3836_vm7, %v239_v58, %v243_v36  ;;  %437 = vst [vmem:[#allocation2 + $0x2c] sm:$0xf] %v420_v10  ;;  %v467_v10 = vshll.u32 %v441_v43, 16 }
  0x90   : > { %1898 = vmatprep.subr.bf16.mxu0 %v3289_v6  ;;  %1970 = vmatpush1.bf16.msra.mxu1 %v3284_v7  ;;  %v429_v6 = vor.u32 %v428_v61, %v425_v59  ;;  %v185_v7 = vld [vmem:[%s3801_s24 + $0x18] sm:$0xf]  ;;  %252 = vst [vmem:[#allocation2 + $0x34] sm:$0xf] %v244_v54  ;;  %v3337_v59 = vld [vmem:[#allocation6 + $0x2ac] ss:$24 sps:$4 sm:$0xff]  }
  0x91   : > { %1971 = vmatprep.subr.bf16.mxu1 %v3292_v9  ;;  %v3319_v9 = vld [vmem:[#allocation6 + $0xc] ss:$24 sps:$4 sm:$0xff]   ;;  %189 = vst [vmem:[#allocation2 + $0x40] sm:$0xf] %v185_v7  ;;  %v3937_v54 = vld [vmem:[#allocation2 + $0x28] ss:$16 sps:$4 sm:$0xff]   ;;  %v360_v7 = vsel %vm3826_vm6, %v358_v55, %v359_v38 }
  0x92   : > { %372 = vst [vmem:[#allocation2 + $0x58] sm:$0xf] %v360_v7  ;;  %v364_v52 = vrot.slane %v362_v33, 4 }
  0x93   : > { %1899 = vmatpush1.bf16.msra.mxu0 %v3287_v12  ;;  %v421_v12 = vrot.slane %v419_v63, 4  ;;  %v457_v63 = vshll.u32 %v440_v40, 16 }
  0x94   : > { %1900 = vmatprep.subr.bf16.mxu0 %v3295_v15  ;;  %1972 = vmatpush1.bf16.msra.mxu1 %v3290_v14  ;;  %v186_v14 = vld [vmem:[%s3801_s24 + $0x1c] sm:$0xf]  ;;  %v253_v15 = vld [vmem:[%s3801_s24 + $0x18] sm:$0xf] }
  0x95   : > { %1973 = vmatprep.subr.bf16.mxu1 %v3298_v18  ;;  %190 = vst [vmem:[#allocation2 + $0x50] sm:$0xf] %v186_v14  ;;  %v3908_v18 = vld [vmem:[%s3801_s24 + $0x20] sm:$0xf]  ;;  %v259_v19 = vshrl.u32 %v253_v15, 16  ;;  %v430_v20 = vsel %vm3850_vm8, %v421_v12, %v429_v6  ;;  %v459_v14 = vrot.slane %v457_v63, 6 }
  0x96   : > { %438 = vst [vmem:[#allocation2 + $0x3c] sm:$0xf] %v430_v20  ;;  %v282_v11 = vshrl.u32 %v3908_v18, 16  ;;  %v3326_v12 = vld [vmem:[#allocation6 + $0x5d8] ss:$24 sps:$4 sm:$0xff]  }
  0x97   : > { %1901 = vmatpush1.bf16.msra.mxu0 %v3293_v16  ;;  %v3314_v16 = vld [vmem:[#allocation6 + $0x338] ss:$24 sps:$4 sm:$0xff]   ;;  %v261_v26 = vrot.slane %v259_v19, 4  ;;  %v3925_v48 = vld [vmem:[#allocation2 + $0x24] ss:$16 sps:$4 sm:$0xff]   ;;  %v469_v19 = vrot.slane %v467_v10, 6 }
  0x98   : > { %1902 = vmatprep.subr.bf16.mxu0 %v3301_v21  ;;  %1974 = vmatpush1.bf16.msra.mxu1 %v3296_v8  ;;  %v262_v8 = vshll.u32 %v253_v15, 16  ;;  %v268_v21 = vshll.u32 %v254_v17, 16 }
  0x99   : > { %1975 = vmatprep.subr.bf16.mxu1 %v3304_v23  ;;  %v278_v23 = vshll.u32 %v3908_v18, 16  ;;  %1790 = vmatprep.mubr.bf16.mxu0 %v3925_v48 }
  0x9a   : > { %v270_v30 = vrot.slane %v268_v21, 5  ;;  %v284_v21 = vrot.slane %v282_v11, 4  ;;  %v361_v11 = vrot.slane %v359_v38, 4 }
  0x9b   : > { %1903 = vmatpush1.bf16.msra.mxu0 %v3299_v4  ;;  %v264_v4 = vrot.slane %v262_v8, 5  ;;  %v3916_v32 = vrot.slane %v278_v23, 5  ;;  %v3335_v8 = vld [vmem:[#allocation6 + $0x2a8] ss:$24 sps:$4 sm:$0xff]   ;;  %v3346_v23 = vld [vmem:[#allocation6 + $0x57c] ss:$24 sps:$4 sm:$0xff]  }
  0x9c   : > { %1904 = vmatprep.subr.bf16.mxu0 %v3307_v39  ;;  %1976 = vmatpush1.bf16.msra.mxu1 %v3302_v44  ;;  %v439_v39 = vld [vmem:[%s3801_s24 + $0x18] sm:$0xe]  ;;  %v275_v42 = vor.u32 %v274_v31, %v270_v30  ;;  %v3355_v31 = vld [vmem:[#allocation6 + $0x24c] ss:$24 sps:$4 sm:$0xff]  }
  0x9d   : > { %1977 = vmatprep.subr.bf16.mxu1 %v3310_v51  ;;  %v265_v36 = vor.u32 %v264_v4, %v261_v26  ;;  %v445_v44 = vshrl.u32 %v439_v39, 16  ;;  %v448_v45 = vshll.u32 %v439_v39, 16  ;;  %v3341_v26 = vld [vmem:[#allocation6 + $0x278] ss:$24 sps:$4 sm:$0xff]   ;;  %v285_v18 = vor.u32 %v284_v21, %v3916_v32 }
  0x9e   : > { %v276_v53 = vrot.slane %v275_v42, 4  ;;  %v3344_v39 = vld [vmem:[#allocation6 + $0x578] ss:$24 sps:$4 sm:$0xff]  }
  0x9f   : > { %1905 = vmatpush1.bf16.msra.mxu0 %v3305_v50  ;;  %v3927_v50 = vld [vmem:[#allocation2 + $0x20] ss:$16 sps:$4 sm:$0xff]   ;;  %v266_v51 = vrot.slane %v265_v36, 4  ;;  %v450_v58 = vrot.slane %v448_v45, 6  ;;  %v348_v42 = vld [vmem:[%s3801_s24 + $0x28] sm:$0x1] }
  0xa0   : > { %1906 = vmatprep.subr.bf16.mxu0 %v3313_v62  ;;  %1978 = vmatpush1.bf16.msra.mxu1 %v3308_v57  ;;  %v447_v57 = vrot.slane %v445_v44, 5  ;;  %v456_v62 = vrot.slane %v454_v46, 5  ;;  %v281_v6 = vsel %vm3836_vm7, %v276_v53, %v3916_v32  ;;  %v298_v32 = vshll.u32 %v257_v34, 16  ;;  %v3358_v44 = vld [vmem:[#allocation6 + $0x54c] ss:$24 sps:$4 sm:$0xff]  }
  0xa1   : > { %1979 = vmatprep.subr.bf16.mxu1 %v3316_v3  ;;  %v271_v61 = vsel %vm3836_vm7, %v266_v51, %v270_v30  ;;  %v3934_v3 = vld [vmem:[#allocation2 + $0x2c] ss:$16 sps:$4 sm:$0xff]   ;;  %1791 = vmatmul.mubr.bf16.gmra.mxu0 %v3927_v50  ;;  %307 = vst [vmem:[#allocation2 + $0x54] sm:$0xf] %v281_v6  ;;  %v256_v30 = vld [vmem:[%s3801_s24 + $0x24] sm:$0xf]  ;;  %v363_v51 = vsel %vm3826_vm6, %v361_v11, %v362_v33 }
  0xa2   : > { %306 = vst [vmem:[#allocation2 + $0x44] sm:$0xf] %v271_v61  ;;  %1863 = vmatprep.mubr.bf16.mxu1 %v3934_v3  ;;  %v460_v20 = vor.u32 %v459_v14, %v456_v62  ;;  %v292_v36 = vshrl.u32 %v256_v30, 16  ;;  %v3353_v46 = vld [vmem:[#allocation6 + $0x248] ss:$24 sps:$4 sm:$0xff]  }
  0xa3   : > { %1907 = vmatpush1.bf16.msra.mxu0 %v3311_v2  ;;  %v464_v2 = vshrl.u32 %v441_v43, 16  ;;  %1864 = vmatmul.mubr.bf16.gmra.mxu1 %v3937_v54  ;;  %v3968_v43 = vld [vmem:[#allocation2 + $0x40] ss:$16 sps:$4 sm:$0xff]   ;;  %v442_v53 = vld [vmem:[%s3801_s24 + $0x24] sm:$0xf] }
  0xa4   : > { %1908 = vmatprep.subr.bf16.mxu0 %v3319_v9  ;;  %1980 = vmatpush1.bf16.msra.mxu1 %v3314_v16  ;;  %v451_v9 = vor.u32 %v450_v58, %v447_v57  ;;  %v3340_v16 = vld [vmem:[#allocation6 + $0x5ac] ss:$24 sps:$4 sm:$0xff]   ;;  %v462_v27 = vrot.slane %v460_v20, 4  ;;  %v300_v57 = vrot.slane %v298_v32, 5  ;;  %v365_v58 = vrot.slane %v348_v42, 5 }
  0xa5   : > { %1981 = vmatprep.subr.bf16.mxu1 %v3322_v49  ;;  %v466_v15 = vrot.slane %v464_v2, 5  ;;  %v3338_v49 = vld [vmem:[#allocation6 + $0x5a8] ss:$24 sps:$4 sm:$0xff]   ;;  %373 = vst [vmem:[#allocation2 + $0x68] sm:$0xf] %v363_v51  ;;  %v474_v61 = vshrl.u32 %v442_v53, 16 }
  0xa6   : > { %v452_v17 = vrot.slane %v451_v9, 4  ;;  %v3356_v62 = vld [vmem:[#allocation6 + $0x548] ss:$24 sps:$4 sm:$0xff]   ;;  %v477_v2 = vshll.u32 %v442_v53, 16  ;;  %v3361_v9 = vld [vmem:[#allocation6 + $0x21c] ss:$24 sps:$4 sm:$0xff]   ;;  %v366_v10 = vsel %vm3826_vm6, %v364_v52, %v365_v58 }
  0xa7   : > { %1909 = vmatpush1.bf16.msra.mxu0 %v3317_v25  ;;  %v3950_v24 = vor.u32 %v469_v19, %v466_v15  ;;  %v187_v25 = vld [vmem:[%s3801_s24 + $0x20] sm:$0xf]  ;;  %v476_v14 = vrot.slane %v474_v61, 5  ;;  %374 = vst [vmem:[#allocation2 + $0x78] sm:$0xf] %v366_v10  ;;  %vm2513_vm6 = vcmask 1040384  }
  0xa8   : > { %1910 = vmatprep.subr.bf16.mxu0 %v3325_v28  ;;  %1982 = vmatpush1.bf16.msra.mxu1 %v3320_v35  ;;  %v461_v4 = vsel %vm3850_vm8, %v452_v17, %v460_v20  ;;  %v188_v28 = vld [vmem:[%s3801_s24 + $0x24] sm:$0xf]  ;;  %191 = vst [vmem:[#allocation2 + $0x60] sm:$0xf] %v187_v25  ;;  %v288_v35 = vshll.u32 %v256_v30, 16 }
  0xa9   : > { %1983 = vmatprep.subr.bf16.mxu1 %v3328_v41  ;;  %496 = vst [vmem:[#allocation2 + $0x4c] sm:$0xf] %v461_v4  ;;  %192 = vst [vmem:[#allocation2 + $0x70] sm:$0xf] %v188_v28  ;;  %v471_v40 = vsel %vm3850_vm8, %v462_v27, %v3950_v24  ;;  %v286_v41 = vrot.slane %v285_v18, 4 }
  0xaa   : > { %v3966_v38 = vld [vmem:[#allocation2 + $0x44] ss:$16 sps:$4 sm:$0xff]   ;;  %497 = vst [vmem:[#allocation2 + $0x5c] sm:$0xf] %v471_v40  ;;  %v290_v45 = vrot.slane %v288_v35, 5 }
  0xab   : > { %1911 = vmatpush2.bf16.msra.mxu0 %v3323_v47  ;;  %v294_v47 = vrot.slane %v292_v36, 4  ;;  %1800 = vmatprep.mubr.bf16.mxu0 %v3966_v38  ;;  %v3983_v21 = vld [vmem:[#allocation2 + $0x48] ss:$16 sps:$4 sm:$0xff]   ;;  %v3376_v27 = vld [vmem:[#allocation6 + $0x4ec] ss:$24 sps:$4 sm:$0xff]  }
  0xac   : > { %1912 = vmatprep.subr.bf16.mxu0 %v3337_v59  ;;  %1984 = vmatpush2.bf16.msra.mxu1 %v3326_v12  ;;  %v291_v55 = vsel %vm3836_vm7, %v286_v41, %v290_v45  ;;  %v443_v59 = vld [vmem:[%s3801_s24 + $0x28] sm:$0x3]  ;;  %v472_v12 = vrot.slane %v3950_v24, 4  ;;  %v3373_v24 = vld [vmem:[#allocation6 + $0x1ec] ss:$24 sps:$4 sm:$0xff]  }
  0xad   : > { %1985 = vmatprep.subr.bf16.mxu1 %v3340_v16  ;;  %v295_v63 = vor.u32 %v294_v47, %v290_v45  ;;  %308 = vst [vmem:[#allocation2 + $0x64] sm:$0xf] %v291_v55  ;;  %v484_v6 = vshrl.u32 %v443_v59, 16  ;;  %v487_v7 = vshll.u32 %v443_v59, 16  ;;  %1801 = vmatmul.mubr.bf16.gmra.mxu0 %v3968_v43  ;;  %v479_v16 = vrot.slane %v477_v2, 6 }
  0xae   : > { %v3362_v25 = vld [vmem:[#allocation6 + $0x518] ss:$24 sps:$4 sm:$0xff]   ;;  %v3371_v28 = vld [vmem:[#allocation6 + $0x1e8] ss:$24 sps:$4 sm:$0xff]   ;;  %v3379_v30 = vld [vmem:[#allocation6 + $0x1bc] ss:$24 sps:$4 sm:$0xff]  }
  0xaf   : > { %1913 = vmatpush2.bf16.msra.mxu0 %v3335_v8  ;;  %v296_v15 = vrot.slane %v295_v63, 4  ;;  %v486_v17 = vrot.slane %v484_v6, 5  ;;  %v489_v19 = vrot.slane %v487_v7, 6  ;;  %v3359_v8 = vld [vmem:[#allocation6 + $0x218] ss:$24 sps:$4 sm:$0xff]  }
  0xb0   : > { %1914 = vmatprep.subr.bf16.mxu0 %v3343_v22  ;;  %1986 = vmatpush2.bf16.msra.mxu1 %v3338_v49  ;;  %v3364_v49 = vld [vmem:[#allocation6 + $0x51c] ss:$24 sps:$4 sm:$0xff]   ;;  %v480_v22 = vor.u32 %v479_v16, %v476_v14  ;;  %v3374_v18 = vld [vmem:[#allocation6 + $0x4e8] ss:$24 sps:$4 sm:$0xff]   ;;  %v3377_v11 = vld [vmem:[#allocation6 + $0x1b8] ss:$24 sps:$4 sm:$0xff]  }
  0xb1   : > { %1987 = vmatprep.subr.bf16.mxu1 %v3346_v23  ;;  %v3981_v20 = vld [vmem:[#allocation2 + $0x4c] ss:$16 sps:$4 sm:$0xff]   ;;  %v301_v5 = vsel %vm3836_vm7, %v296_v15, %v300_v57  ;;  %v490_v23 = vor.u32 %v489_v19, %v486_v17  ;;  %v3995_v35 = vld [vmem:[#allocation2 + $0x60] ss:$16 sps:$4 sm:$0xff]   ;;  %v4001_v41 = vld [vmem:[#allocation2 + $0x68] ss:$16 sps:$4 sm:$0xff]  }
  0xb2   : > { %309 = vst [vmem:[#allocation2 + $0x74] sm:$0xf] %v301_v5  ;;  %1873 = vmatprep.mubr.bf16.mxu1 %v3981_v20  ;;  %v482_v4 = vrot.slane %v480_v22, 4  ;;  %v3385_v36 = vld [vmem:[#allocation6 + $0x18c] ss:$24 sps:$4 sm:$0xff]  }
  0xb3   : > { %1915 = vmatpush2.bf16.msra.mxu0 %v3341_v26  ;;  %v481_v26 = vsel %vm3850_vm8, %v472_v12, %v480_v22  ;;  %1874 = vmatmul.mubr.bf16.gmra.mxu1 %v3983_v21  ;;  %v3391_v32 = vld [vmem:[#allocation6 + $0x164] ss:$24 sps:$4 sm:$0xff]   ;;  %v3386_v42 = vld [vmem:[#allocation6 + $0x488] ss:$24 sps:$4 sm:$0xff]   ;;  %v3397_v45 = vld [vmem:[#allocation6 + $0x134] ss:$24 sps:$4 sm:$0xff]  }
  0xb4   : > { %1916 = vmatprep.subr.bf16.mxu0 %v3355_v31  ;;  %1988 = vmatpush2.bf16.msra.mxu1 %v3344_v39  ;;  %498 = vst [vmem:[#allocation2 + $0x6c] sm:$0xf] %v481_v26  ;;  %v491_v13 = vsel %vm3850_vm8, %v482_v4, %v490_v23  ;;  %v3382_v31 = vld [vmem:[#allocation6 + $0x4bc] ss:$24 sps:$4 sm:$0xff]   ;;  %v3388_v39 = vld [vmem:[#allocation6 + $0x48c] ss:$24 sps:$4 sm:$0xff]  }
  0xb5   : > { %1989 = vmatprep.subr.bf16.mxu1 %v3358_v44  ;;  %499 = vst [vmem:[#allocation2 + $0x7c] sm:$0xf] %v491_v13  ;;  %v3394_v33 = vld [vmem:[#allocation6 + $0x464] ss:$24 sps:$4 sm:$0xff]   ;;  %v3389_v44 = vld [vmem:[#allocation6 + $0x160] ss:$24 sps:$4 sm:$0xff]  }
  0xb6   : > { %v3400_v47 = vld [vmem:[#allocation6 + $0x434] ss:$24 sps:$4 sm:$0xff]   ;;  %v3403_v51 = vld [vmem:[#allocation6 + $0x104] ss:$24 sps:$4 sm:$0xff]   ;;  %v3398_v52 = vld [vmem:[#allocation6 + $0x430] ss:$24 sps:$4 sm:$0xff]  }
  0xb7   : > { %1917 = vmatpush2.bf16.msra.mxu0 %v3353_v46  ;;  %v3395_v46 = vld [vmem:[#allocation6 + $0x130] ss:$24 sps:$4 sm:$0xff]   ;;  %v3401_v53 = vld [vmem:[#allocation6 + $0x100] ss:$24 sps:$4 sm:$0xff]   ;;  %v3412_v58 = vld [vmem:[#allocation6 + $0x3d4] ss:$24 sps:$4 sm:$0xff]  }
  0xb8   : > { %1918 = vmatprep.subr.bf16.mxu0 %v3361_v9  ;;  %1990 = vmatpush2.bf16.msra.mxu1 %v3356_v62  ;;  %v3404_v55 = vld [vmem:[#allocation6 + $0x400] ss:$24 sps:$4 sm:$0xff]   ;;  %v3407_v57 = vld [vmem:[#allocation6 + $0xd0] ss:$24 sps:$4 sm:$0xff]   ;;  %v3418_v62 = vld [vmem:[#allocation6 + $0x3a4] ss:$24 sps:$4 sm:$0xff]  }
  0xb9   : > { %1991 = vmatprep.subr.bf16.mxu1 %v3364_v49  ;;  %v3993_v34 = vld [vmem:[#allocation2 + $0x64] ss:$16 sps:$4 sm:$0xff]   ;;  %v3410_v59 = vld [vmem:[#allocation6 + $0x3d0] ss:$24 sps:$4 sm:$0xff]   ;;  %v3413_v61 = vld [vmem:[#allocation6 + $0xa0] ss:$24 sps:$4 sm:$0xff]  }
  0xba   : > { %1810 = vmatprep.mubr.bf16.mxu0 %v3993_v34  ;;  %v3421_v63 = vld [vmem:[#allocation6 + $0x74] ss:$24 sps:$4 sm:$0xff]   ;;  %v3416_v2 = vld [vmem:[#allocation6 + $0x3a0] ss:$24 sps:$4 sm:$0xff]   ;;  %v3419_v6 = vld [vmem:[#allocation6 + $0x70] ss:$24 sps:$4 sm:$0xff]  }
  0xbb   : > { %1919 = vmatpush2.bf16.msra.mxu0 %v3359_v8  ;;  %v3424_v7 = vld [vmem:[#allocation6 + $0x374] ss:$24 sps:$4 sm:$0xff]   ;;  %v3427_v9 = vld [vmem:[#allocation6 + $0x44] ss:$24 sps:$4 sm:$0xff]   ;;  %v3422_v10 = vld [vmem:[#allocation6 + $0x370] ss:$24 sps:$4 sm:$0xff]  }
  0xbc   : > { %1920 = vmatprep.subr.bf16.mxu0 %v3373_v24  ;;  %1992 = vmatpush2.bf16.msra.mxu1 %v3362_v25  ;;  %v3999_v40 = vld [vmem:[#allocation2 + $0x6c] ss:$16 sps:$4 sm:$0xff]   ;;  %v3425_v12 = vld [vmem:[#allocation6 + $0x40] ss:$24 sps:$4 sm:$0xff]   ;;  %v3431_v17 = vld [vmem:[#allocation6 + $0x10] ss:$24 sps:$4 sm:$0xff]  }
  0xbd   : > { %1993 = vmatprep.subr.bf16.mxu1 %v3376_v27  ;;  %1811 = vmatmul.mubr.bf16.gmra.mxu0 %v3995_v35  ;;  %v3430_v14 = vld [vmem:[#allocation6 + $0x344] ss:$24 sps:$4 sm:$0xff]   ;;  %v3433_v15 = vld [vmem:[#allocation6 + $0x14] ss:$24 sps:$4 sm:$0xff]   ;;  %v3428_v16 = vld [vmem:[#allocation6 + $0x340] ss:$24 sps:$4 sm:$0xff]  }
  0xbe   : > { %1926 = vmatprep.mubr.bf16.mxu0 %v3866_v56  ;;  %1883 = vmatprep.mubr.bf16.mxu1 %v3999_v40  ;;  %v3392_v56 = vld [vmem:[#allocation6 + $0x460] ss:$24 sps:$4 sm:$0xff]   ;;  %v3436_v19 = vld [vmem:[#allocation6 + $0x314] ss:$24 sps:$4 sm:$0xff]   ;;  %v3439_v8 = vld [vmem:[#allocation6 + $0x2e4] ss:$24 sps:$4 sm:$0xff]  }
  0xbf   : > { %1921 = vmatpush2.bf16.msra.mxu0 %v3371_v28  ;;  %1884 = vmatmul.mubr.bf16.gmra.mxu1 %v4001_v41  ;;  %v3529_v49 = vld [vmem:[#allocation2 + $0x4] ss:$16 sps:$4 sm:$0xff]   ;;  %v3434_v5 = vld [vmem:[#allocation6 + $0x310] ss:$24 sps:$4 sm:$0xff]   ;;  %v3437_v22 = vld [vmem:[#allocation6 + $0x2e0] ss:$24 sps:$4 sm:$0xff]  }
  0xc0   : > { %1922 = vmatprep.subr.bf16.mxu0 %v3379_v30  ;;  %1994 = vmatpush2.bf16.msra.mxu1 %v3374_v18  ;;  %v3442_v23 = vld [vmem:[#allocation6 + $0x5e4] ss:$24 sps:$4 sm:$0xff]   ;;  %v3445_v24 = vld [vmem:[#allocation6 + $0x2b4] ss:$24 sps:$4 sm:$0xff]   ;;  %v3440_v26 = vld [vmem:[#allocation6 + $0x5e0] ss:$24 sps:$4 sm:$0xff]  }
  0xc1   : > { %1995 = vmatprep.subr.bf16.mxu1 %v3382_v31  ;;  %1999 = vmatprep.mubr.bf16.mxu1 %v3872_v0  ;;  %v3406_v0 = vld [vmem:[#allocation6 + $0x404] ss:$24 sps:$4 sm:$0xff]   ;;  %v3443_v4 = vld [vmem:[#allocation6 + $0x2b0] ss:$24 sps:$4 sm:$0xff]   ;;  %v3448_v27 = vld [vmem:[#allocation6 + $0x5b4] ss:$24 sps:$4 sm:$0xff]  }
  0xc2   : > { %v3530_v25 = vld [vmem:[#allocation2 + $0xc] ss:$16 sps:$4 sm:$0xff]   ;;  %v3446_v28 = vld [vmem:[#allocation6 + $0x5b0] ss:$24 sps:$4 sm:$0xff]   ;;  %v3449_v30 = vld [vmem:[#allocation6 + $0x280] ss:$24 sps:$4 sm:$0xff]  }
  0xc3   : > { %1923 = vmatpush2.bf16.msra.mxu0 %v3377_v11  ;;  %v3451_v13 = vld [vmem:[#allocation6 + $0x284] ss:$24 sps:$4 sm:$0xff]   ;;  %v3457_v11 = vld [vmem:[#allocation6 + $0x254] ss:$24 sps:$4 sm:$0xff]   ;;  %v3452_v31 = vld [vmem:[#allocation6 + $0x580] ss:$24 sps:$4 sm:$0xff]  }
  0xc4   : > { %1924 = vmatprep.subr.bf16.mxu0 %v3385_v36  ;;  %1996 = vmatpush2.bf16.msra.mxu1 %v3380_v29  ;;  %v3454_v18 = vld [vmem:[#allocation6 + $0x584] ss:$24 sps:$4 sm:$0xff]   ;;  %v3455_v36 = vld [vmem:[#allocation6 + $0x250] ss:$24 sps:$4 sm:$0xff]   ;;  %v3460_v29 = vld [vmem:[#allocation6 + $0x554] ss:$24 sps:$4 sm:$0xff]  }
  0xc5   : > { %1997 = vmatprep.subr.bf16.mxu1 %v3388_v39  ;;  %v3458_v39 = vld [vmem:[#allocation6 + $0x550] ss:$24 sps:$4 sm:$0xff]  }
  0xc7   : > { %1925 = vmatpush2.bf16.msra.mxu0 %v3383_v37  ;;  %v3463_v37 = vld [vmem:[#allocation6 + $0x224] ss:$24 sps:$4 sm:$0xff]  }
  0xc8   : > { %2040 = vmatprep.subr.bf16.mxu0 %v3391_v32  ;;  %1998 = vmatpush2.bf16.msra.mxu1 %v3386_v42  ;;  %v3461_v32 = vld [vmem:[#allocation6 + $0x220] ss:$24 sps:$4 sm:$0xff]   ;;  %v3466_v42 = vld [vmem:[#allocation6 + $0x524] ss:$24 sps:$4 sm:$0xff]  }
  0xc9   : > { %2113 = vmatprep.subr.bf16.mxu1 %v3394_v33  ;;  %v3469_v33 = vld [vmem:[#allocation6 + $0x1f4] ss:$24 sps:$4 sm:$0xff]  }
  0xca   : > { %1927 = vmatmul.mubr.bf16.vlgmr.msra.gmra.mxu0 %v3870_v60  ;;  %v3409_v60 = vld [vmem:[#allocation6 + $0xd4] ss:$24 sps:$4 sm:$0xff]  }
  0xcb   : > { %2041 = vmatpush1.bf16.msra.mxu0 %v3389_v44  ;;  %1936 = vmatprep.mubr.bf16.mxu0 %v3925_v48  ;;  %v3464_v44 = vld [vmem:[#allocation6 + $0x520] ss:$24 sps:$4 sm:$0xff]  }
  0xcc   : > { %2042 = vmatprep.subr.bf16.mxu0 %v3397_v45  ;;  %2000 = vmatmul.mubr.bf16.vlgmr.msra.gmra.mxu1 %v3874_v1  ;;  %v3415_v1 = vld [vmem:[#allocation6 + $0xa4] ss:$24 sps:$4 sm:$0xff]   ;;  %v3467_v45 = vld [vmem:[#allocation6 + $0x1f0] ss:$24 sps:$4 sm:$0xff]  }
  0xcd   : > { %2114 = vmatpush1.bf16.msra.mxu1 %v3392_v56  ;;  %2009 = vmatprep.mubr.bf16.mxu1 %v3934_v3  ;;  %v3472_v56 = vld [vmem:[#allocation6 + $0x4f4] ss:$24 sps:$4 sm:$0xff]  }
  0xce   : > { %2115 = vmatprep.subr.bf16.mxu1 %v3400_v47  ;;  %v3470_v47 = vld [vmem:[#allocation6 + $0x4f0] ss:$24 sps:$4 sm:$0xff]  }
  0xcf   : > { %2043 = vmatpush1.bf16.msra.mxu0 %v3395_v46  ;;  %v3475_v46 = vld [vmem:[#allocation6 + $0x1c4] ss:$24 sps:$4 sm:$0xff]  }
  0xd0   : > { %2044 = vmatprep.subr.bf16.mxu0 %v3403_v51  ;;  %v3473_v51 = vld [vmem:[#allocation6 + $0x1c0] ss:$24 sps:$4 sm:$0xff]  }
  0xd1   : > { %2116 = vmatpush1.bf16.msra.mxu1 %v3398_v52  ;;  %v3478_v52 = vld [vmem:[#allocation6 + $0x4c4] ss:$24 sps:$4 sm:$0xff]  }
  0xd2   : > { %1937 = vmatmul.mubr.bf16.gmra.mxu0 %v3927_v50  ;;  %2117 = vmatprep.subr.bf16.mxu1 %v3406_v0  ;;  %v3476_v0 = vld [vmem:[#allocation6 + $0x4c0] ss:$24 sps:$4 sm:$0xff]  }
  0xd3   : > { %2045 = vmatpush1.bf16.msra.mxu0 %v3401_v53  ;;  %1946 = vmatprep.mubr.bf16.mxu0 %v3966_v38  ;;  %v3481_v53 = vld [vmem:[#allocation6 + $0x194] ss:$24 sps:$4 sm:$0xff]  }
  0xd4   : > { %2046 = vmatprep.subr.bf16.mxu0 %v3409_v60  ;;  %2010 = vmatmul.mubr.bf16.gmra.mxu1 %v3937_v54  ;;  %v3479_v60 = vld [vmem:[#allocation6 + $0x190] ss:$24 sps:$4 sm:$0xff]  }
  0xd5   : > { %2118 = vmatpush1.bf16.msra.mxu1 %v3404_v55  ;;  %2019 = vmatprep.mubr.bf16.mxu1 %v3981_v20  ;;  %v3484_v55 = vld [vmem:[#allocation6 + $0x494] ss:$24 sps:$4 sm:$0xff]  }
  0xd6   : > { %2119 = vmatprep.subr.bf16.mxu1 %v3412_v58  ;;  %v3531_v58 = vld [vmem:[#allocation2] ss:$16 sps:$4 sm:$0xff]  }
  0xd7   : > { %2047 = vmatpush1.bf16.msra.mxu0 %v3407_v57  ;;  %v3482_v57 = vld [vmem:[#allocation6 + $0x490] ss:$24 sps:$4 sm:$0xff]  }
  0xd8   : > { %2048 = vmatprep.subr.bf16.mxu0 %v3415_v1  ;;  %v3532_v1 = vld [vmem:[#allocation2 + $0x8] ss:$16 sps:$4 sm:$0xff]  }
  0xd9   : > { %2120 = vmatpush1.bf16.msra.mxu1 %v3410_v59 }
  0xda   : > { %1947 = vmatmul.mubr.bf16.gmra.mxu0 %v3968_v43  ;;  %2121 = vmatprep.subr.bf16.mxu1 %v3418_v62 }
  0xdb   : > { %2049 = vmatpush1.bf16.msra.mxu0 %v3413_v61  ;;  %1956 = vmatprep.mubr.bf16.mxu0 %v3993_v34 }
  0xdc   : > { %2050 = vmatprep.subr.bf16.mxu0 %v3421_v63  ;;  %2020 = vmatmul.mubr.bf16.gmra.mxu1 %v3983_v21 }
  0xdd   : > { %2122 = vmatpush1.bf16.msra.mxu1 %v3416_v2  ;;  %2029 = vmatprep.mubr.bf16.mxu1 %v3999_v40 }
  0xde   : > { %2123 = vmatprep.subr.bf16.mxu1 %v3424_v7 }
  0xdf   : > { %2051 = vmatpush1.bf16.msra.mxu0 %v3419_v6 }
  0xe0   : > { %2052 = vmatprep.subr.bf16.mxu0 %v3427_v9 }
  0xe1   : > { %2124 = vmatpush1.bf16.msra.mxu1 %v3422_v10 }
  0xe2   : > { %1957 = vmatmul.mubr.bf16.gmra.mxu0 %v3995_v35  ;;  %2125 = vmatprep.subr.bf16.mxu1 %v3430_v14 }
  0xe3   : > { %2053 = vmatpush1.bf16.msra.mxu0 %v3425_v12  ;;  %2072 = vmatprep.mubr.bf16.mxu0 %v3529_v49 }
  0xe4   : > { %2054 = vmatprep.subr.bf16.mxu0 %v3433_v15  ;;  %2030 = vmatmul.mubr.bf16.gmra.mxu1 %v4001_v41 }
  0xe5   : > { %2126 = vmatpush1.bf16.msra.mxu1 %v3428_v16  ;;  %2145 = vmatprep.mubr.bf16.mxu1 %v3530_v25 }
  0xe6   : > { %2127 = vmatprep.subr.bf16.mxu1 %v3436_v19 }
  0xe7   : > { %2055 = vmatpush1.bf16.msra.mxu0 %v3431_v17 }
  0xe8   : > { %2056 = vmatprep.subr.bf16.mxu0 %v3439_v8 }
  0xe9   : > { %2128 = vmatpush1.bf16.msra.mxu1 %v3434_v5 }
  0xea   : > { %2129 = vmatprep.subr.bf16.mxu1 %v3442_v23 }
  0xeb   : > { %2057 = vmatpush2.bf16.msra.mxu0 %v3437_v22 }
  0xec   : > { %2058 = vmatprep.subr.bf16.mxu0 %v3445_v24 }
  0xed   : > { %2130 = vmatpush2.bf16.msra.mxu1 %v3440_v26 }
  0xee   : > { %2131 = vmatprep.subr.bf16.mxu1 %v3448_v27 }
  0xef   : > { %2059 = vmatpush2.bf16.msra.mxu0 %v3443_v4 }
  0xf0   : > { %2060 = vmatprep.subr.bf16.mxu0 %v3451_v13 }
  0xf1   : > { %2132 = vmatpush2.bf16.msra.mxu1 %v3446_v28 }
  0xf2   : > { %2133 = vmatprep.subr.bf16.mxu1 %v3454_v18 }
  0xf3   : > { %2061 = vmatpush2.bf16.msra.mxu0 %v3449_v30 }
  0xf4   : > { %2062 = vmatprep.subr.bf16.mxu0 %v3457_v11 }
  0xf5   : > { %2134 = vmatpush2.bf16.msra.mxu1 %v3452_v31 }
  0xf6   : > { %2135 = vmatprep.subr.bf16.mxu1 %v3460_v29 }
  0xf7   : > { %2063 = vmatpush2.bf16.msra.mxu0 %v3455_v36 }
  0xf8   : > { %2064 = vmatprep.subr.bf16.mxu0 %v3463_v37 }
  0xf9   : > { %2136 = vmatpush2.bf16.msra.mxu1 %v3458_v39 }
  0xfa   : > { %2137 = vmatprep.subr.bf16.mxu1 %v3466_v42 }
  0xfb   : > { %2065 = vmatpush2.bf16.msra.mxu0 %v3461_v32 }
  0xfc   : > { %2066 = vmatprep.subr.bf16.mxu0 %v3469_v33 }
  0xfd   : > { %2138 = vmatpush2.bf16.msra.mxu1 %v3464_v44 }
  0xfe   : > { %2139 = vmatprep.subr.bf16.mxu1 %v3472_v56 }
  0xff   : > { %2067 = vmatpush2.bf16.msra.mxu0 %v3467_v45  ;;  %v2258_v45 = vlaneseq }
 0x100   : > { %2068 = vmatprep.subr.bf16.mxu0 %v3475_v46 }
 0x101   : > { %2140 = vmatpush2.bf16.msra.mxu1 %v3470_v47 }
 0x102   : > { %2141 = vmatprep.subr.bf16.mxu1 %v3478_v52 }
 0x103   : > { %2069 = vmatpush2.bf16.msra.mxu0 %v3473_v51 }
 0x104   : > { %2070 = vmatprep.subr.bf16.mxu0 %v3481_v53 }
 0x105   : > { %2142 = vmatpush2.bf16.msra.mxu1 %v3476_v0 }
 0x106   : > { %2143 = vmatprep.subr.bf16.mxu1 %v3484_v55  ;;  %v4056_v55 = vshrl.u32 %v2258_v45, 7 }
 0x107   : > { %2071 = vmatpush2.bf16.msra.mxu0 %v3479_v60 }
 0x109   : > { %2144 = vmatpush2.bf16.msra.mxu1 %v3482_v57 }
 0x10a   : > { %2073 = vmatmul.mubr.bf16.vlgmr.msra.gmra.mxu0 %v3531_v58 }
 0x10b   : > { %2082 = vmatprep.mubr.bf16.mxu0 %v3925_v48 }
 0x10c   : > { %2146 = vmatmul.mubr.bf16.vlgmr.msra.gmra.mxu1 %v3532_v1 }
 0x10d   : > { %2155 = vmatprep.mubr.bf16.mxu1 %v3934_v3 }
 0x112   : > { %2083 = vmatmul.mubr.bf16.gmra.mxu0 %v3927_v50 }
 0x113   : > { %2092 = vmatprep.mubr.bf16.mxu0 %v3966_v38 }
 0x114   : > { %2156 = vmatmul.mubr.bf16.gmra.mxu1 %v3937_v54 }
 0x115   : > { %2165 = vmatprep.mubr.bf16.mxu1 %v3981_v20 }
 0x11a   : > { %2093 = vmatmul.mubr.bf16.gmra.mxu0 %v3968_v43 }
 0x11b   : > { %2102 = vmatprep.mubr.bf16.mxu0 %v3993_v34 }
 0x11c   : > { %2166 = vmatmul.mubr.bf16.gmra.mxu1 %v3983_v21 }
 0x11d   : > { %2175 = vmatprep.mubr.bf16.mxu1 %v3999_v40 }
 0x122   : > { %2103 = vmatmul.mubr.bf16.gmra.mxu0 %v3995_v35 }
 0x124   : > { %2176 = vmatmul.mubr.bf16.gmra.mxu1 %v4001_v41 }
 0x14a   : > { %v1782_v48 = vpop.f32.mrf.mxu0 }
 0x14b   : > { %v1855_v50 = vpop.f32.mrf.mxu1 }
 0x14c   : > { %v1784_v3 = vpop.f32.mrf.mxu0  ;;  %v1856_v38 = vadd.f32 %v1855_v50, %v1782_v48 }
 0x14d   : > { %v1857_v59 = vpop.f32.mrf.mxu1 }
 0x14e   : > { %v1786_v54 = vpop.f32.mrf.mxu0  ;;  %v4033_v61 = vadd.f32 %v1857_v59, %v1784_v3  ;;  %v2186_v51 = vmul.f32 %v1856_v38, %v1856_v38  ;;  %v4063_v38 = vadd.s32 16, %v4056_v55 }
 0x14f   : > { %v1859_v20 = vpop.f32.mrf.mxu1 }
 0x150   : > { %v1788_v43 = vpop.f32.mrf.mxu0  ;;  %v1860_v62 = vadd.f32 %v1859_v20, %v1786_v54  ;;  %vm2265_vm9 = vcmp.lt.s32.totalorder %v4063_v38, 17 }
 0x151   : > { %v1861_v34 = vpop.f32.mrf.mxu1 }
 0x152   : > { %v4035_v63 = vadd.f32 %v1861_v34, %v1788_v43  ;;  %v2189_v50 = vmul.f32 %v1860_v62, %v1860_v62 }
 0x161   : > { %v1792_v21 = vpop.f32.mrf.mxu0 }
 0x163   : > { %v1794_v40 = vpop.f32.mrf.mxu0  ;;  %v1865_v2 = vpop.f32.mrf.mxu1 }
 0x164   : > { %v1866_v35 = vadd.f32 %v1865_v2, %v1792_v21 }
 0x165   : > { %v1796_v6 = vpop.f32.mrf.mxu0  ;;  %v1867_v41 = vpop.f32.mrf.mxu1 }
 0x166   : > { %v4037_v7 = vadd.f32 %v1867_v41, %v1794_v40  ;;  %v2192_v2 = vmul.f32 %v1866_v35, %v1866_v35 }
 0x167   : > { %v1798_v9 = vpop.f32.mrf.mxu0  ;;  %v1869_v10 = vpop.f32.mrf.mxu1 }
 0x169   : > { %v1871_v12 = vpop.f32.mrf.mxu1 }
 0x16d   : > { %v1802_v14 = vpop.f32.mrf.mxu0 }
 0x16f   : > { %v1804_v15 = vpop.f32.mrf.mxu0 }
 0x171   : > { %v1806_v17 = vpop.f32.mrf.mxu0 }
 0x173   : > { %v1875_v16 = vpop.f32.mrf.mxu1  ;;  %v1808_v22 = vpop.f32.mrf.mxu0 }
 0x174   : > { %v4039_v19 = vadd.f32 %v1875_v16, %v1802_v14 }
 0x175   : > { %v1877_v8 = vpop.f32.mrf.mxu1 }
 0x176   : > { %v4041_v49 = vadd.f32 %v1877_v8, %v1804_v15 }
 0x177   : > { %v1879_v5 = vpop.f32.mrf.mxu1 }
 0x178   : > { %v4043_v23 = vadd.f32 %v1879_v5, %v1806_v17 }
 0x179   : > { %v1881_v24 = vpop.f32.mrf.mxu1 }
 0x17a   : > { %v4045_v25 = vadd.f32 %v1881_v24, %v1808_v22 }
 0x17d   : > { %v1812_v26 = vpop.f32.mrf.mxu0 }
 0x17f   : > { %v1814_v4 = vpop.f32.mrf.mxu0  ;;  %v1885_v27 = vpop.f32.mrf.mxu1 }
 0x180   : > { %v4047_v28 = vadd.f32 %v1885_v27, %v1812_v26  ;;  %v2222_v26 = vmul.f32 %v4039_v19, %v4039_v19 }
 0x181   : > { %v1816_v13 = vpop.f32.mrf.mxu0  ;;  %v1887_v30 = vpop.f32.mrf.mxu1 }
 0x182   : > { %v4049_v11 = vadd.f32 %v1887_v30, %v1814_v4 }
 0x183   : > { %v1818_v18 = vpop.f32.mrf.mxu0  ;;  %v1889_v31 = vpop.f32.mrf.mxu1 }
 0x185   : > { %v1891_v29 = vpop.f32.mrf.mxu1 }
 0x18a   : > { %v1928_v36 = vpop.f32.mrf.mxu0 }
 0x18c   : > { %v1930_v37 = vpop.f32.mrf.mxu0  ;;  %v2001_v39 = vpop.f32.mrf.mxu1 }
 0x18d   : > { %v4051_v42 = vadd.f32 %v2001_v39, %v1928_v36 }
 0x18e   : > { %v1932_v32 = vpop.f32.mrf.mxu0  ;;  %v2003_v33 = vpop.f32.mrf.mxu1 }
 0x18f   : > { %v2004_v56 = vadd.f32 %v2003_v33, %v1930_v37  ;;  %v2225_v37 = vmul.f32 %v4043_v23, %v4043_v23 }
 0x190   : > { %v1934_v44 = vpop.f32.mrf.mxu0  ;;  %v2005_v46 = vpop.f32.mrf.mxu1 }
 0x191   : > { %v2198_v52 = vmul.f32 %v2004_v56, %v2004_v56  ;;  %v4053_v53 = vadd.f32 %v2005_v46, %v1932_v32 }
 0x192   : > { %v1938_v47 = vpop.f32.mrf.mxu0  ;;  %v2007_v0 = vpop.f32.mrf.mxu1 }
 0x193   : > { %v4058_v57 = vadd.f32 %v2198_v52, %v2186_v51  ;;  %v2008_v58 = vadd.f32 %v2007_v0, %v1934_v44 }
 0x194   : > { %v1940_v60 = vpop.f32.mrf.mxu0  ;;  %v2011_v1 = vpop.f32.mrf.mxu1 }
 0x195   : > { %v2201_v3 = vmul.f32 %v2008_v58, %v2008_v58  ;;  %v4060_v59 = vadd.f32 %v2011_v1, %v1938_v47  ;;  %v2228_v47 = vmul.f32 %v4047_v28, %v4047_v28  ;;  %3485 = vrsqrt.f32 %v4058_v57 }
 0x196   : > { %v1942_v48 = vpop.f32.mrf.mxu0  ;;  %v2013_v54 = vpop.f32.mrf.mxu1  ;;  %vm2293_vm10 = vcmp.eq.f32.partialorder %v4058_v57, inf  ;;  %vm2295_vm11 = vcmp.eq.f32.partialorder %v4058_v57, 0.0 }
 0x197   : > { %v2014_v43 = vadd.f32 %v2013_v54, %v1940_v60  ;;  %v4065_v34 = vadd.f32 %v2201_v3, %v2189_v50 }
 0x198   : > { %v1944_v20 = vpop.f32.mrf.mxu0  ;;  %v2015_v21 = vpop.f32.mrf.mxu1 }
 0x199   : > { %v2204_v6 = vmul.f32 %v2014_v43, %v2014_v43  ;;  %v2459_v10 = vadd.f32 %v4065_v34, %v4058_v57  ;;  %v2187_v20 = vmul.f32 %v4033_v61, %v4033_v61  ;;  %vm2314_vm12 = vcmp.eq.f32.partialorder %v4065_v34, inf }
 0x19a   : > { %v1948_v40 = vpop.f32.mrf.mxu0  ;;  %v2017_v41 = vpop.f32.mrf.mxu1  ;;  %vm2316_vm13 = vcmp.eq.f32.partialorder %v4065_v34, 0.0  ;;  %v2317_v61 = vand.u32 2147483648, %v4065_v34 }
 0x19b   : > { %v2216_v62 = vadd.f32 %v2204_v6, %v2192_v2 }
 0x19c   : > { %v1950_v9 = vpop.f32.mrf.mxu0  ;;  %v2021_v12 = vpop.f32.mrf.mxu1 }
 0x19d   : > { %v4072_v15 = vsel %vm2265_vm9, %v2216_v62, 0.0  ;;  %v4074_v16 = vadd.f32 %v2021_v12, %v1948_v40  ;;  %v2296_v40 = vand.u32 2147483648, %v4058_v57 }
 0x19e   : > { %v1952_v14 = vpop.f32.mrf.mxu0  ;;  %v2023_v17 = vpop.f32.mrf.mxu1  ;;  %v2460_v5 = vadd.f32 %v2459_v10, %v4072_v15  ;;  %vm2335_vm14 = vcmp.eq.f32.partialorder %v4072_v15, inf  ;;  %v2338_v62 = vand.u32 2147483648, %v4072_v15  ;;  %vm2337_vm5 = vcmp.eq.f32.partialorder %v4072_v15, 0.0 }
 0x19f   : > { %v2024_v35 = vadd.f32 %v2023_v17, %v1950_v9 }
 0x1a0   : > { %v1954_v8 = vpop.f32.mrf.mxu0  ;;  %v2025_v22 = vpop.f32.mrf.mxu1  ;;  %v2462_v3 = vrot.slane %v2460_v5, 4 }
 0x1a1   : > { %v2234_v4 = vmul.f32 %v2024_v35, %v2024_v35  ;;  %v4079_v27 = vadd.f32 %v2025_v22, %v1952_v14 }
 0x1a2   : > { %v1958_v24 = vpop.f32.mrf.mxu0  ;;  %v2027_v13 = vpop.f32.mrf.mxu1  ;;  %v2463_v14 = vadd.f32 %v2462_v3, %v2460_v5  ;;  %v2190_v3 = vmul.f32 %v4035_v63, %v4035_v63 }
 0x1a3   : > { %v4081_v18 = vadd.f32 %v2234_v4, %v2222_v26  ;;  %v2028_v31 = vadd.f32 %v2027_v13, %v1954_v8  ;;  %v3486_v28 = vpop.eup %3485 }
 0x1a4   : > { %v1960_v30 = vpop.f32.mrf.mxu0  ;;  %v2031_v36 = vpop.f32.mrf.mxu1  ;;  %v2292_v43 = vmul.f32 %v3486_v28, %v4058_v57 }
 0x1a5   : > { %v2237_v39 = vmul.f32 %v2028_v31, %v2028_v31  ;;  %v4085_v32 = vadd.f32 %v2031_v36, %v1958_v24  ;;  %vm2377_vm0 = vcmp.eq.f32.partialorder %v4081_v18, inf  ;;  %vm2379_vm1 = vcmp.eq.f32.partialorder %v4081_v18, 0.0 }
 0x1a6   : > { %v1962_v29 = vpop.f32.mrf.mxu0  ;;  %v2033_v33 = vpop.f32.mrf.mxu1  ;;  %v2294_v17 = vsel %vm2293_vm10, %v4058_v57, %v2292_v43  ;;  %v2380_v24 = vand.u32 2147483648, %v4081_v18 }
 0x1a7   : > { %v2034_v56 = vadd.f32 %v2033_v33, %v1960_v30  ;;  %v2249_v19 = vadd.f32 %v2237_v39, %v2225_v37  ;;  %v4130_v31 = vsel %vm2295_vm11, %v2296_v40, %v2294_v17  ;;  %v2464_v33 = vrot.slane %v2463_v14, 2 }
 0x1a8   : > { %v1964_v44 = vpop.f32.mrf.mxu0  ;;  %v2035_v46 = vpop.f32.mrf.mxu1 }
 0x1a9   : > { %v2240_v51 = vmul.f32 %v2034_v56, %v2034_v56  ;;  %v2486_v60 = vadd.f32 %v2249_v19, %v4081_v18  ;;  %3487 = vrsqrt.f32 %v2249_v19  ;;  %vm2398_vm15 = vcmp.eq.f32.partialorder %v2249_v19, inf }
 0x1aa   : > { %v2037_v52 = vpop.f32.mrf.mxu1  ;;  %3489 = vrsqrt.f32 %v4081_v18  ;;  %v2401_v26 = vand.u32 2147483648, %v2249_v19  ;;  %vm2400_vm2 = vcmp.eq.f32.partialorder %v2249_v19, 0.0 }
 0x1ab   : > { %v2252_v0 = vadd.f32 %v2240_v51, %v2228_v47  ;;  %3491 = vrsqrt.f32 %v4065_v34 }
 0x1ad   : > { %v4092_v58 = vsel %vm2265_vm9, %v2252_v0, 0.0 }
 0x1ae   : > { %v4095_v23 = vadd.f32 %v2486_v60, %v4092_v58  ;;  %3493 = vrsqrt.f32 %v4092_v58  ;;  %vm2419_vm3 = vcmp.eq.f32.partialorder %v4092_v58, inf  ;;  %v2422_v56 = vand.u32 2147483648, %v4092_v58 }
 0x1af   : > { %3495 = vrsqrt.f32 %v4072_v15  ;;  %vm2421_vm4 = vcmp.eq.f32.partialorder %v4092_v58, 0.0 }
 0x1b6   : > { %v3488_v1 = vpop.eup %3487 }
 0x1b7   : > { %v3490_v48 = vpop.eup %3489  ;;  %v2397_v21 = vmul.f32 %v3488_v1, %v2249_v19 }
 0x1b8   : > { %v3492_v50 = vpop.eup %3491  ;;  %v2376_v2 = vmul.f32 %v3490_v48, %v4081_v18 }
 0x1b9   : > { %v2313_v9 = vmul.f32 %v3492_v50, %v4065_v34  ;;  %v2399_v8 = vsel %vm2398_vm15, %v2249_v19, %v2397_v21 }
 0x1ba   : > { %v2378_v22 = vsel %vm2377_vm0, %v4081_v18, %v2376_v2  ;;  %v4132_v36 = vsel %vm2400_vm2, %v2401_v26, %v2399_v8  ;;  %v2489_v18 = vrot.slane %v4095_v23, 4 }
 0x1bb   : > { %v3494_v54 = vpop.eup %3493  ;;  %v2315_v5 = vsel %vm2314_vm12, %v4065_v34, %v2313_v9  ;;  %v4137_v44 = vsel %vm2379_vm1, %v2380_v24, %v2378_v22  ;;  %v2193_v22 = vmul.f32 %v4037_v7, %v4037_v7 }
 0x1bc   : > { %v3496_v41 = vpop.eup %3495  ;;  %v2418_v10 = vmul.f32 %v3494_v54, %v4092_v58  ;;  %v4145_v47 = vsel %vm2316_vm13, %v2317_v61, %v2315_v5  ;;  %v2610_v34 = vsub.f32 %v4130_v31, %v4137_v44  ;;  %v2188_v54 = vmul.f32 %v4051_v42, %v4051_v42 }
 0x1bd   : > { %v2334_v35 = vmul.f32 %v3496_v41, %v4072_v15  ;;  %v2613_v60 = vsub.f32 %v4145_v47, %v4132_v36 }
 0x1be   : > { %v2420_v29 = vsel %vm2419_vm3, %v4092_v58, %v2418_v10  ;;  %v2465_v10 = vadd.f32 %v2464_v33, %v2463_v14  ;;  %v2682_v63 = vmul.f32 %v2610_v34, %v2610_v34 }
 0x1bf   : > { %v2336_v57 = vsel %vm2335_vm14, %v4072_v15, %v2334_v35  ;;  %v4149_v0 = vsel %vm2421_vm4, %v2422_v56, %v2420_v29  ;;  %v2685_v41 = vmul.f32 %v2613_v60, %v2613_v60 }
 0x1c0   : > { %v4162_v43 = vsel %vm2337_vm5, %v2338_v62, %v2336_v57  ;;  %v2466_v29 = vrot.slane %v2465_v10, 1 }
 0x1c1   : > { %v2616_v21 = vsub.f32 %v4162_v43, %v4149_v0 }
 0x1c3   : > { %v2688_v24 = vmul.f32 %v2616_v21, %v2616_v21 }
 0x1ca   : > { %v2074_v6 = vpop.f32.mrf.mxu0 }
 0x1cc   : > { %v2076_v12 = vpop.f32.mrf.mxu0  ;;  %v2147_v4 = vpop.f32.mrf.mxu1 }
 0x1cd   : > { %v2148_v30 = vadd.f32 %v2147_v4, %v2074_v6 }
 0x1ce   : > { %v2078_v13 = vpop.f32.mrf.mxu0  ;;  %v2149_v37 = vpop.f32.mrf.mxu1 }
 0x1cf   : > { %v2199_v19 = vmul.f32 %v2148_v30, %v2148_v30  ;;  %v2150_v46 = vadd.f32 %v2149_v37, %v2076_v12  ;;  %v2694_v30 = vadd.f32 %v2685_v41, %v2682_v63 }
 0x1d0   : > { %v2080_v39 = vpop.f32.mrf.mxu0  ;;  %v2151_v51 = vpop.f32.mrf.mxu1 }
 0x1d1   : > { %v2200_v28 = vmul.f32 %v2150_v46, %v2150_v46  ;;  %v2152_v1 = vadd.f32 %v2151_v51, %v2078_v13  ;;  %v4156_v48 = vadd.f32 %v2199_v19, %v2187_v20  ;;  %v2490_v20 = vadd.f32 %v2489_v18, %v4095_v23 }
 0x1d2   : > { %v2084_v52 = vpop.f32.mrf.mxu0  ;;  %v2153_v50 = vpop.f32.mrf.mxu1  ;;  %v2191_v23 = vmul.f32 %v4053_v53, %v4053_v53  ;;  %v3663_v13 = vmov 1966171168   ;;  %v2194_v19 = vmul.f32 %v4060_v59, %v4060_v59  ;;  %v2695_v46 = vadd.f32 %v2694_v30, %v2688_v24 }
 0x1d3   : > { %v2202_v40 = vmul.f32 %v2152_v1, %v2152_v1  ;;  %v2154_v15 = vadd.f32 %v2153_v50, %v2080_v39  ;;  %v4167_v9 = vadd.f32 %v2200_v28, %v2188_v54  ;;  %3497 = vrsqrt.f32 %v4156_v48 }
 0x1d4   : > { %v2086_v58 = vpop.f32.mrf.mxu0  ;;  %v2157_v2 = vpop.f32.mrf.mxu1  ;;  %v2491_v14 = vrot.slane %v2490_v20, 2  ;;  %v4176_v5 = vunpack.c.l.s4 %v3663_v13  ;;  %v2223_v59 = vmul.f32 %v4041_v49, %v4041_v49  ;;  %vm2300_vm7 = vcmp.eq.f32.partialorder %v4156_v48, inf }
 0x1d5   : > { %v2158_v61 = vadd.f32 %v2157_v2, %v2084_v52  ;;  %v4170_v12 = vadd.f32 %v2202_v40, %v2190_v3  ;;  %v2203_v17 = vmul.f32 %v2154_v15, %v2154_v15  ;;  %3499 = vrsqrt.f32 %v4167_v9 }
 0x1d6   : > { %v2088_v6 = vpop.f32.mrf.mxu0  ;;  %v2159_v42 = vpop.f32.mrf.mxu1  ;;  %v2492_v52 = vadd.f32 %v2491_v14, %v2490_v20  ;;  %v2655_v34 = vunpack.c.0.s8 %v4176_v5  ;;  %v2467_v3 = vadd.f32 %v2466_v29, %v2465_v10  ;;  %v2226_v2 = vmul.f32 %v4045_v25, %v4045_v25 }
 0x1d7   : > { %v2205_v8 = vmul.f32 %v2158_v61, %v2158_v61  ;;  %v2160_v35 = vadd.f32 %v2159_v42, %v2086_v58  ;;  %v4179_v37 = vadd.f32 %v2203_v17, %v2191_v23  ;;  %v2468_v53 = vadd.f32 %v4170_v12, %v4156_v48 }
 0x1d8   : > { %v2090_v62 = vpop.f32.mrf.mxu0  ;;  %v2161_v26 = vpop.f32.mrf.mxu1  ;;  %3501 = vrsqrt.f32 %v4170_v12  ;;  %v2697_v6 = vrot.slane %v2695_v46, 4  ;;  %v2493_v41 = vrot.slane %v2492_v52, 1  ;;  %v2229_v61 = vmul.f32 %v4049_v11, %v4049_v11 }
 0x1d9   : > { %v2217_v39 = vadd.f32 %v2205_v8, %v2193_v22  ;;  %v2206_v33 = vmul.f32 %v2160_v35, %v2160_v35  ;;  %3503 = vrsqrt.f32 %v4179_v37  ;;  %v2477_v1 = vadd.f32 %v4179_v37, %v4167_v9 }
 0x1da   : > { %v2094_v4 = vpop.f32.mrf.mxu0  ;;  %v2163_v56 = vpop.f32.mrf.mxu1  ;;  %v2224_v62 = vmul.f32 %v4074_v16, %v4074_v16  ;;  %v2227_v23 = vmul.f32 %v4079_v27, %v4079_v27  ;;  %v2230_v11 = vmul.f32 %v4085_v32, %v4085_v32  ;;  %v4220_v24 = vsel %vm2513_vm6, %v2467_v3, 0.0 }
 0x1db   : > { %v4189_v18 = vsel %vm2265_vm9, %v2217_v39, 0.0  ;;  %v2218_v60 = vadd.f32 %v2206_v33, %v2194_v19  ;;  %v4222_v16 = vadd.f32 %v2697_v6, %v2695_v46  ;;  %v4226_v30 = vadd.f32 %v2493_v41, %v2492_v52 }
 0x1dc   : > { %v2096_v7 = vpop.f32.mrf.mxu0  ;;  %v2167_v57 = vpop.f32.mrf.mxu1  ;;  %3505 = vrsqrt.f32 %v4189_v18  ;;  %v2469_v15 = vadd.f32 %v2468_v53, %v4189_v18  ;;  %vm2302_vm8 = vcmp.eq.f32.partialorder %v4156_v48, 0.0  ;;  %v2303_v39 = vand.u32 2147483648, %v4156_v48 }
 0x1dd   : > { %v2168_v28 = vadd.f32 %v2167_v57, %v2094_v4  ;;  %v4199_v54 = vsel %vm2265_vm9, %v2218_v60, 0.0  ;;  %vm2307_vm10 = vcmp.eq.f32.partialorder %v4167_v9, inf  ;;  %vm2309_vm11 = vcmp.eq.f32.partialorder %v4167_v9, 0.0 }
 0x1de   : > { %v2098_v51 = vpop.f32.mrf.mxu0  ;;  %v2169_v50 = vpop.f32.mrf.mxu1  ;;  %3507 = vrsqrt.f32 %v4199_v54  ;;  %v2471_v25 = vrot.slane %v2469_v15, 4  ;;  %v4212_v35 = vadd.f32 %v2477_v1, %v4199_v54  ;;  %vm2321_vm12 = vcmp.eq.f32.partialorder %v4170_v12, inf }
 0x1df   : > { %v2235_v21 = vmul.f32 %v2168_v28, %v2168_v28  ;;  %v2170_v40 = vadd.f32 %v2169_v50, %v2096_v7  ;;  %v2324_v50 = vand.u32 2147483648, %v4170_v12  ;;  %vm2323_vm13 = vcmp.eq.f32.partialorder %v4170_v12, 0.0 }
 0x1e0   : > { %v2100_v58 = vpop.f32.mrf.mxu0  ;;  %v2171_v49 = vpop.f32.mrf.mxu1  ;;  %v2472_v7 = vadd.f32 %v2471_v25, %v2469_v15  ;;  %vm2328_vm14 = vcmp.eq.f32.partialorder %v4179_v37, inf  ;;  %vm2342_vm15 = vcmp.eq.f32.partialorder %v4189_v18, inf  ;;  %vm2344_vm0 = vcmp.eq.f32.partialorder %v4189_v18, 0.0 }
 0x1e1   : > { %v4206_v10 = vadd.f32 %v2235_v21, %v2223_v59  ;;  %v2236_v63 = vmul.f32 %v2170_v40, %v2170_v40  ;;  %v2172_v42 = vadd.f32 %v2171_v49, %v2098_v51  ;;  %v3498_v22 = vpop.eup %3497  ;;  %v2310_v51 = vand.u32 2147483648, %v4167_v9 }
 0x1e2   : > { %v2104_v20 = vpop.f32.mrf.mxu0  ;;  %v2173_v17 = vpop.f32.mrf.mxu1  ;;  %v2299_v53 = vmul.f32 %v3498_v22, %v4156_v48  ;;  %v2473_v15 = vrot.slane %v2472_v7, 2  ;;  %v2345_v49 = vand.u32 2147483648, %v4189_v18  ;;  %vm2349_vm2 = vcmp.eq.f32.partialorder %v4199_v54, inf }
 0x1e3   : > { %3509 = vrsqrt.f32 %v4206_v10  ;;  %v4224_v26 = vadd.f32 %v2236_v63, %v2224_v62  ;;  %v2238_v4 = vmul.f32 %v2172_v42, %v2172_v42  ;;  %v2174_v27 = vadd.f32 %v2173_v17, %v2100_v58  ;;  %v3500_v29 = vpop.eup %3499 }
 0x1e4   : > { %v2106_v8 = vpop.f32.mrf.mxu0  ;;  %v2177_v14 = vpop.f32.mrf.mxu1  ;;  %v2306_v59 = vmul.f32 %v3500_v29, %v4167_v9  ;;  %v2331_v58 = vand.u32 2147483648, %v4179_v37  ;;  %v2301_v6 = vsel %vm2300_vm7, %v4156_v48, %v2299_v53  ;;  %vm2384_vm1 = vcmp.eq.f32.partialorder %v4206_v10, inf }
 0x1e5   : > { %v2178_v32 = vadd.f32 %v2177_v14, %v2104_v20  ;;  %3511 = vrsqrt.f32 %v4224_v26  ;;  %v4235_v19 = vadd.f32 %v2238_v4, %v2226_v2  ;;  %v2239_v46 = vmul.f32 %v2174_v27, %v2174_v27  ;;  %v3502_v57 = vpop.eup %3501 }
 0x1e6   : > { %v2108_v13 = vpop.f32.mrf.mxu0  ;;  %v2179_v33 = vpop.f32.mrf.mxu1  ;;  %v2352_v20 = vand.u32 2147483648, %v4199_v54  ;;  %v2320_v63 = vmul.f32 %v3502_v57, %v4170_v12  ;;  %v2308_v42 = vsel %vm2307_vm10, %v4167_v9, %v2306_v59  ;;  %v4269_v25 = vsel %vm2302_vm8, %v2303_v39, %v2301_v6 }
 0x1e7   : > { %v2241_v52 = vmul.f32 %v2178_v32, %v2178_v32  ;;  %v2180_v60 = vadd.f32 %v2179_v33, %v2106_v8  ;;  %v3504_v1 = vpop.eup %3503  ;;  %3513 = vrsqrt.f32 %v4235_v19  ;;  %v4246_v3 = vadd.f32 %v2239_v46, %v2227_v23 }
 0x1e8   : > { %v2110_v56 = vpop.f32.mrf.mxu0  ;;  %v2181_v28 = vpop.f32.mrf.mxu1  ;;  %v2474_v22 = vadd.f32 %v2473_v15, %v2472_v7  ;;  %v2480_v23 = vrot.slane %v4212_v35, 4  ;;  %v2327_v14 = vmul.f32 %v3504_v1, %v4179_v37  ;;  %vm2386_vm3 = vcmp.eq.f32.partialorder %v4206_v10, 0.0 }
 0x1e9   : > { %v2253_v21 = vadd.f32 %v2241_v52, %v2229_v61  ;;  %v3506_v2 = vpop.eup %3505  ;;  %v2242_v41 = vmul.f32 %v2180_v60, %v2180_v60  ;;  %v2387_v61 = vand.u32 2147483648, %v4206_v10  ;;  %3515 = vrsqrt.f32 %v4246_v3 }
 0x1ea   : > { %v2183_v40 = vpop.f32.mrf.mxu1  ;;  %v2341_v62 = vmul.f32 %v3506_v2, %v4189_v18  ;;  %vm2391_vm4 = vcmp.eq.f32.partialorder %v4224_v26, inf  ;;  %v2322_v27 = vsel %vm2321_vm12, %v4170_v12, %v2320_v63  ;;  %vm2330_vm5 = vcmp.eq.f32.partialorder %v4179_v37, 0.0 }
 0x1eb   : > { %v4264_v17 = vsel %vm2265_vm9, %v2253_v21, 0.0  ;;  %v2254_v8 = vadd.f32 %v2242_v41, %v2230_v11  ;;  %v3508_v4 = vpop.eup %3507  ;;  %v2394_v11 = vand.u32 2147483648, %v4224_v26  ;;  %vm2393_vm7 = vcmp.eq.f32.partialorder %v4224_v26, 0.0 }
 0x1ec   : > { %3517 = vrsqrt.f32 %v4264_v17  ;;  %vm2405_vm8 = vcmp.eq.f32.partialorder %v4235_v19, inf  ;;  %v4289_v32 = vsel %vm2309_vm11, %v2310_v51, %v2308_v42  ;;  %v2343_v38 = vsel %vm2342_vm15, %v4189_v18, %v2341_v62 }
 0x1ed   : > { %v4279_v13 = vsel %vm2265_vm9, %v2254_v8, 0.0  ;;  %vm2407_vm9 = vcmp.eq.f32.partialorder %v4235_v19, 0.0  ;;  %v2408_v39 = vand.u32 2147483648, %v4235_v19  ;;  %v2475_v33 = vrot.slane %v2474_v22, 1 }
 0x1ee   : > { %3519 = vrsqrt.f32 %v4279_v13  ;;  %v2481_v56 = vadd.f32 %v2480_v23, %v4212_v35  ;;  %v2495_v9 = vadd.f32 %v4235_v19, %v4206_v10  ;;  %v2504_v7 = vadd.f32 %v4246_v3, %v4224_v26 }
 0x1ef   : > { %v2329_v46 = vsel %vm2328_vm14, %v4179_v37, %v2327_v14  ;;  %v2348_v57 = vmul.f32 %v3508_v4, %v4199_v54  ;;  %vm2412_vm10 = vcmp.eq.f32.partialorder %v4246_v3, inf  ;;  %v4310_v51 = vsel %vm2323_vm13, %v2324_v50, %v2322_v27 }
 0x1f0   : > { %v3510_v48 = vpop.eup %3509  ;;  %vm2414_vm11 = vcmp.eq.f32.partialorder %v4246_v3, 0.0  ;;  %v2415_v52 = vand.u32 2147483648, %v4246_v3  ;;  %v2476_v60 = vadd.f32 %v2475_v33, %v2474_v22  ;;  %v2482_v28 = vrot.slane %v2481_v56, 2 }
 0x1f1   : > { %v2383_v29 = vmul.f32 %v3510_v48, %v4206_v10  ;;  %v4317_v1 = vsel %vm2344_vm0, %v2345_v49, %v2343_v38  ;;  %vm2426_vm12 = vcmp.eq.f32.partialorder %v4264_v17, inf  ;;  %v2496_v12 = vadd.f32 %v2495_v9, %v4264_v17 }
 0x1f2   : > { %v3512_v53 = vpop.eup %3511  ;;  %v2505_v50 = vadd.f32 %v2504_v7, %v4279_v13  ;;  %vm2428_vm13 = vcmp.eq.f32.partialorder %v4264_v17, 0.0  ;;  %v2483_v18 = vadd.f32 %v2482_v28, %v2481_v56  ;;  %v2515_v15 = vsel %vm2513_vm6, %v2476_v60, 0.0 }
 0x1f3   : > { %v2390_v35 = vmul.f32 %v3512_v53, %v4224_v26  ;;  %v2385_v59 = vsel %vm2384_vm1, %v4206_v10, %v2383_v29  ;;  %v2350_v2 = vsel %vm2349_vm2, %v4199_v54, %v2348_v57  ;;  %v2429_v49 = vand.u32 2147483648, %v4264_v17 }
 0x1f4   : > { %v3514_v21 = vpop.eup %3513  ;;  %v2516_v41 = vadd.f32 %v2515_v15, %v4220_v24  ;;  %vm2351_vm14 = vcmp.eq.f32.partialorder %v4199_v54, 0.0  ;;  %v4339_v63 = vsel %vm2386_vm3, %v2387_v61, %v2385_v59  ;;  %v2484_v42 = vrot.slane %v2483_v18, 1 }
 0x1f5   : > { %v2392_v40 = vsel %vm2391_vm4, %v4224_v26, %v2390_v35  ;;  %v2404_v6 = vmul.f32 %v3514_v21, %v4235_v19  ;;  %v2498_v62 = vrot.slane %v2496_v12, 4  ;;  %v2507_v8 = vrot.slane %v2505_v50, 4 }
 0x1f6   : > { %v3516_v22 = vpop.eup %3515  ;;  %v4348_v4 = vsel %vm2330_vm5, %v2331_v58, %v2329_v46  ;;  %v4352_v24 = vsel %vm2393_vm7, %v2394_v11, %v2392_v40  ;;  %vm2433_vm15 = vcmp.eq.f32.partialorder %v4279_v13, inf  ;;  %vm2435_vm0 = vcmp.eq.f32.partialorder %v4279_v13, 0.0 }
 0x1f7   : > { %v2406_v23 = vsel %vm2405_vm8, %v4235_v19, %v2404_v6  ;;  %v2411_v10 = vmul.f32 %v3516_v22, %v4246_v3  ;;  %v2485_v14 = vadd.f32 %v2484_v42, %v2483_v18  ;;  %v2611_v37 = vsub.f32 %v4269_v25, %v4339_v63 }
 0x1f8   : > { %v4358_v61 = vsel %vm2407_vm9, %v2408_v39, %v2406_v23  ;;  %v2499_v58 = vadd.f32 %v2498_v62, %v2496_v12  ;;  %v2508_v11 = vadd.f32 %v2507_v8, %v2505_v50  ;;  %v2612_v38 = vsub.f32 %v4289_v32, %v4352_v24 }
 0x1f9   : > { %v3518_v48 = vpop.eup %3517  ;;  %v2614_v26 = vsub.f32 %v4310_v51, %v4358_v61  ;;  %v2413_v27 = vsel %vm2412_vm10, %v4246_v3, %v2411_v10  ;;  %v2517_v29 = vsel %vm2513_vm6, %v2485_v14, 0.0  ;;  %v2683_v28 = vmul.f32 %v2611_v37, %v2611_v37 }
 0x1fa   : > { %v2425_v19 = vmul.f32 %v3518_v48, %v4264_v17  ;;  %v4374_v56 = vsel %vm2414_vm11, %v2415_v52, %v2413_v27  ;;  %v2518_v9 = vadd.f32 %v2517_v29, %v2516_v41  ;;  %v2500_v7 = vrot.slane %v2499_v58, 2 }
 0x1fb   : > { %v3520_v39 = vpop.eup %3519  ;;  %v2686_v33 = vmul.f32 %v2614_v26, %v2614_v26  ;;  %v2615_v57 = vsub.f32 %v4348_v4, %v4374_v56  ;;  %v2509_v35 = vrot.slane %v2508_v11, 2  ;;  %v2436_v3 = vand.u32 2147483648, %v4279_v13 }
 0x1fc   : > { %v2427_v53 = vsel %vm2426_vm12, %v4264_v17, %v2425_v19  ;;  %v2432_v46 = vmul.f32 %v3520_v39, %v4279_v13  ;;  %2519 = vadd.xlane.f32.xlu0 %v2518_v9  ;;  %v2501_v52 = vadd.f32 %v2500_v7, %v2499_v58  ;;  %v4396_v17 = vsel %vm2351_vm14, %v2352_v20, %v2350_v2 }
 0x1fd   : > { %v4384_v60 = vsel %vm2428_vm13, %v2429_v49, %v2427_v53  ;;  %v2687_v50 = vmul.f32 %v2615_v57, %v2615_v57  ;;  %v2510_v21 = vadd.f32 %v2509_v35, %v2508_v11  ;;  %v2684_v18 = vmul.f32 %v2612_v38, %v2612_v38 }
 0x1fe   : > { %v2617_v59 = vsub.f32 %v4317_v1, %v4384_v60  ;;  %v2434_v12 = vsel %vm2433_vm15, %v4279_v13, %v2432_v46  ;;  %v2502_v15 = vrot.slane %v2501_v52, 1  ;;  %v2703_v49 = vadd.f32 %v2686_v33, %v2683_v28 }
 0x1ff   : > { %v4400_v40 = vsel %vm2435_vm0, %v2436_v3, %v2434_v12  ;;  %v2511_v42 = vrot.slane %v2510_v21, 1  ;;  %v4407_v62 = vsub.s32 %v2655_v34, %v4056_v55  ;;  %v2699_v54 = vrot.slane %v4222_v16, 2 }
 0x200   : > { %v2689_v6 = vmul.f32 %v2617_v59, %v2617_v59  ;;  %v2618_v41 = vsub.f32 %v4396_v17, %v4400_v40  ;;  %v2503_v20 = vadd.f32 %v2502_v15, %v2501_v52  ;;  %v2712_v8 = vadd.f32 %v2687_v50, %v2684_v18 }
 0x201   : > { %v2512_v22 = vadd.f32 %v2511_v42, %v2510_v21  ;;  %v2536_v23 = vsel %vm2513_vm6, %v4226_v30, 0.0  ;;  %v2700_v58 = vadd.f32 %v2699_v54, %v4222_v16  ;;  %vm4420_vm1 = vcmp.lt.s32.totalorder %v2258_v45, 384 }
 0x202   : > { %v2704_v13 = vadd.f32 %v2703_v49, %v2689_v6  ;;  %v2690_v2 = vmul.f32 %v2618_v41, %v2618_v41  ;;  %v2537_v10 = vsel %vm2513_vm6, %v2503_v20, 0.0  ;;  %v2754_v14 = vcombine.low %v4226_v30, %v2503_v20 }
 0x203   : > { %v2538_v5 = vadd.f32 %v2537_v10, %v2536_v23  ;;  %v2539_v55 = vsel %vm2513_vm6, %v2512_v22, 0.0  ;;  %v2768_v26 = vrot.slane %v2512_v22, %v4407_v62  ;;  %v2701_v9 = vrot.slane %v2700_v58, 1 }
 0x204   : > { %v2706_v48 = vrot.slane %v2704_v13, 4  ;;  %v2713_v37 = vadd.f32 %v2712_v8, %v2690_v2  ;;  %v2761_v34 = vrot.slane %v2754_v14, %v4407_v62  ;;  %v3664_v8 = vmov 0.0  }
 0x205   : > { %v2540_v19 = vadd.f32 %v2539_v55, %v2538_v5  ;;  %v2702_v46 = vadd.f32 %v2701_v9, %v2700_v58  ;;  %2781 = vst [vmem:[%s4425_s17] sm:$0xf8] %v3664_v8  ;;  %2782 = vst [vmem:[%s4425_s17 + $0x8] sm:$0xf8] %v3664_v8 }
 0x206   : > { %v2707_v11 = vadd.f32 %v2706_v48, %v2704_v13  ;;  %v2715_v27 = vrot.slane %v2713_v37, 4  ;;  %v2769_v38 = vcombine.low %v2761_v34, %v2768_v26  ;;  %2783 = vst [vmem:[%s4425_s17 + $0x10] sm:$0xf8] %v3664_v8 }
 0x207   : > { %2541 = vadd.xlane.f32.xlu0 %v2540_v19 }
 0x208   : > { %v2708_v30 = vrot.slane %v2707_v11, 2  ;;  %v2716_v39 = vadd.f32 %v2715_v27, %v2713_v37  ;;  %v2776_v33 = vrot.slane %v2769_v38, %v4407_v62 }
 0x20a   : > { %v2709_v7 = vadd.f32 %v2708_v30, %v2707_v11  ;;  %v2717_v53 = vrot.slane %v2716_v39, 2  ;;  %3097 = vst.msk [vmem:[%s4425_s17 + $0x2] ss:$8 sm:$0x7] %vm4420_vm1, %v2776_v33 }
 0x20c   : > { %v2710_v16 = vrot.slane %v2709_v7, 1  ;;  %v2718_v45 = vadd.f32 %v2717_v53, %v2716_v39 }
 0x20e   : > { %v2711_v57 = vadd.f32 %v2710_v16, %v2709_v7  ;;  %v2719_v35 = vrot.slane %v2718_v45, 1 }
 0x210   : > { %v2724_v28 = vcombine.low %v2702_v46, %v2711_v57  ;;  %v2720_v3 = vadd.f32 %v2719_v35, %v2718_v45 }
 0x212   : > { %v2731_v52 = vrot.slane %v2724_v28, %v4407_v62  ;;  %v2738_v59 = vrot.slane %v2720_v3, %v4407_v62 }
 0x214   : > { %v2739_v12 = vcombine.low %v2731_v52, %v2738_v59 }
 0x216   : > { %v2746_v50 = vrot.slane %v2739_v12, %v4407_v62 }
 0x218   : > { %3096 = vst.msk [vmem:[%s4425_s17 + $0x1] ss:$8 sm:$0x7] %vm4420_vm1, %v2746_v50 }
 0x285   : > { %v2520_v21 = vpop.xlane.xlu0 %2519 }
 0x286   : > { %v2521_v18 = vrot.slane %v2520_v21, 4 }
 0x288   : > { %v2522_v15 = vadd.f32 %v2521_v18, %v2520_v21 }
 0x28a   : > { %v2523_v6 = vrot.slane %v2522_v15, 2 }
 0x28c   : > { %v2524_v49 = vadd.f32 %v2523_v6, %v2522_v15 }
 0x28e   : > { %v2525_v41 = vrot.slane %v2524_v49, 1 }
 0x290   : > { %v2526_v42 = vadd.f32 %v2525_v41, %v2524_v49  ;;  %v2542_v54 = vpop.xlane.xlu0 %2541 }
 0x291   : > { %v2543_v20 = vrot.slane %v2542_v54, 4 }
 0x292   : > { %3105 = vpush %v2526_v42 }
 0x293   : > { %v2544_v13 = vadd.f32 %v2543_v20, %v2542_v54 }
 0x295   : > { %v2545_v2 = vrot.slane %v2544_v13, 2 }
 0x297   : > { %v2546_v22 = vadd.f32 %v2545_v2, %v2544_v13 }
 0x299   : > { %v2547_v23 = vrot.slane %v2546_v22, 1 }
 0x29b   : > { %v2548_v10 = vadd.f32 %v2547_v23, %v2546_v22 }
 0x29d   : > { %3107 = vpush %v2548_v10 }
 0x2c3   : > { %s3106_s8 = spop %3105 }
 0x2c4   : > { %v2528_v14 = vstv %s3106_s8 }
 0x2c5   : > { %3521 = vrsqrt.f32 %v2528_v14  ;;  %vm2531_vm6 = vcmp.eq.f32.partialorder %v2528_v14, inf  ;;  %v2534_v34 = vand.u32 2147483648, %v2528_v14  ;;  %vm2533_vm2 = vcmp.eq.f32.partialorder %v2528_v14, 0.0 }
 0x2ce   : > { %s3108_s14 = spop %3107 }
 0x2cf   : > { %v2550_v48 = vstv %s3108_s14 }
 0x2d0   : > { %3523 = vrsqrt.f32 %v2550_v48  ;;  %vm2553_vm3 = vcmp.eq.f32.partialorder %v2550_v48, inf  ;;  %v2556_v19 = vand.u32 2147483648, %v2550_v48  ;;  %vm2555_vm4 = vcmp.eq.f32.partialorder %v2550_v48, 0.0 }
 0x2d2   : > { %v3522_v37 = vpop.eup %3521 }
 0x2d3   : > { %v2530_v5 = vmul.f32 %v3522_v37, %v2528_v14 }
 0x2d5   : > { %v2532_v55 = vsel %vm2531_vm6, %v2528_v14, %v2530_v5 }
 0x2d6   : > { %v2535_v26 = vsel %vm2533_vm2, %v2534_v34, %v2532_v55 }
 0x2d7   : > { %v2558_v58 = vadd.f32 1e-08, %v2535_v26 }
 0x2d9   : > { %3525 = vrcp.f32 %v2558_v58 }
 0x2dd   : > { %v3524_v11 = vpop.eup %3523 }
 0x2de   : > { %v2552_v27 = vmul.f32 %v3524_v11, %v2550_v48 }
 0x2e0   : > { %v2554_v38 = vsel %vm2553_vm3, %v2550_v48, %v2552_v27 }
 0x2e1   : > { %v2557_v30 = vsel %vm2555_vm4, %v2556_v19, %v2554_v38 }
 0x2e2   : > { %v2560_v39 = vadd.f32 1e-08, %v2557_v30 }
 0x2e4   : > { %3527 = vrcp.f32 %v2560_v39 }
 0x2e6   : > { %v3526_v33 = vpop.eup %3525 }
 0x2e7   : > { %v2562_v9 = vmul.f32 %v3526_v33, %v4130_v31  ;;  %v2563_v7 = vmul.f32 %v3526_v33, %v4269_v25  ;;  %v2564_v53 = vmul.f32 %v3526_v33, %v4289_v32  ;;  %v2565_v16 = vmul.f32 %v3526_v33, %v4145_v47 }
 0x2e8   : > { %v2566_v45 = vmul.f32 %v3526_v33, %v4310_v51  ;;  %v2567_v57 = vmul.f32 %v3526_v33, %v4348_v4  ;;  %v2568_v35 = vmul.f32 %v3526_v33, %v4162_v43  ;;  %v2569_v28 = vmul.f32 %v3526_v33, %v4317_v1 }
 0x2e9   : > { %v2570_v3 = vmul.f32 %v3526_v33, %v4396_v17 }
 0x2f1   : > { %v3528_v46 = vpop.eup %3527 }
 0x2f2   : > { %v2574_v52 = vmul.f32 %v3528_v46, %v4137_v44  ;;  %v2575_v31 = vmul.f32 %v3528_v46, %v4339_v63  ;;  %v2576_v25 = vmul.f32 %v3528_v46, %v4352_v24  ;;  %v2577_v32 = vmul.f32 %v3528_v46, %v4132_v36 }
 0x2f3   : > { %v2578_v47 = vmul.f32 %v3528_v46, %v4358_v61  ;;  %v2579_v51 = vmul.f32 %v3528_v46, %v4374_v56  ;;  %v2580_v4 = vmul.f32 %v3528_v46, %v4149_v0  ;;  %v2581_v43 = vmul.f32 %v3528_v46, %v4384_v60 }
 0x2f4   : > { %v2582_v1 = vmul.f32 %v3528_v46, %v4400_v40  ;;  %v2583_v59 = vmul.f32 0.0, %v3528_v46  ;;  %v2586_v17 = vsub.f32 %v2562_v9, %v2574_v52  ;;  %v2587_v12 = vsub.f32 %v2563_v7, %v2575_v31 }
 0x2f5   : > { %v2588_v44 = vsub.f32 %v2564_v53, %v2576_v25  ;;  %v2589_v50 = vsub.f32 %v2565_v16, %v2577_v32  ;;  %v2590_v63 = vsub.f32 %v2566_v45, %v2578_v47  ;;  %v2591_v21 = vsub.f32 %v2567_v57, %v2579_v51 }
 0x2f6   : > { %v2571_v24 = vmul.f32 0.0, %v3526_v33  ;;  %v2592_v18 = vsub.f32 %v2568_v35, %v2580_v4  ;;  %v2593_v36 = vsub.f32 %v2569_v28, %v2581_v43  ;;  %v2594_v15 = vsub.f32 %v2570_v3, %v2582_v1 }
 0x2f7   : > { %v2598_v61 = vand.u32 2147483647, %v2586_v17  ;;  %v2599_v6 = vand.u32 2147483647, %v2587_v12  ;;  %v2600_v56 = vand.u32 2147483647, %v2588_v44 }
 0x2f8   : > { %v2595_v49 = vsub.f32 %v2571_v24, %v2583_v59  ;;  %v2601_v0 = vand.u32 2147483647, %v2589_v50  ;;  %v2602_v41 = vand.u32 2147483647, %v2590_v63  ;;  %v2603_v60 = vand.u32 2147483647, %v2591_v21 }
 0x2f9   : > { %v2604_v42 = vand.u32 2147483647, %v2592_v18  ;;  %v2605_v40 = vand.u32 2147483647, %v2593_v36  ;;  %v2606_v54 = vand.u32 2147483647, %v2594_v15 }
 0x2fa   : > { %v2622_v20 = vadd.f32 %v2601_v0, %v2598_v61  ;;  %v2631_v13 = vadd.f32 %v2602_v41, %v2599_v6  ;;  %v2640_v2 = vadd.f32 %v2603_v60, %v2600_v56  ;;  %v2607_v8 = vand.u32 2147483647, %v2595_v49 }
 0x2fc   : > { %v2623_v22 = vadd.f32 %v2622_v20, %v2604_v42  ;;  %v2632_v23 = vadd.f32 %v2631_v13, %v2605_v40  ;;  %v2641_v10 = vadd.f32 %v2640_v2, %v2606_v54 }
 0x2fe   : > { %v2624_v14 = vadd.f32 %v2623_v22, %v2607_v8  ;;  %v2633_v48 = vadd.f32 %v2632_v23, %v2607_v8  ;;  %v2642_v37 = vadd.f32 %v2641_v10, %v2607_v8 }
 0x300   : > { %v2625_v5 = vrot.slane %v2624_v14, 4  ;;  %v2634_v55 = vrot.slane %v2633_v48, 4  ;;  %v2643_v34 = vrot.slane %v2642_v37, 4 }
 0x302   : > { %v2626_v26 = vadd.f32 %v2625_v5, %v2624_v14  ;;  %v2635_v58 = vadd.f32 %v2634_v55, %v2633_v48  ;;  %v2644_v11 = vadd.f32 %v2643_v34, %v2642_v37 }
 0x304   : > { %v2627_v27 = vrot.slane %v2626_v26, 2  ;;  %v2636_v19 = vrot.slane %v2635_v58, 2  ;;  %v2645_v38 = vrot.slane %v2644_v11, 2 }
 0x306   : > { %v2628_v30 = vadd.f32 %v2627_v27, %v2626_v26  ;;  %v2637_v39 = vadd.f32 %v2636_v19, %v2635_v58  ;;  %v2646_v33 = vadd.f32 %v2645_v38, %v2644_v11 }
 0x308   : > { %v2629_v9 = vrot.slane %v2628_v30, 1  ;;  %v2638_v7 = vrot.slane %v2637_v39, 1  ;;  %v2647_v53 = vrot.slane %v2646_v33, 1 }
 0x30a   : > { %v2630_v16 = vadd.f32 %v2629_v9, %v2628_v30  ;;  %v2639_v45 = vadd.f32 %v2638_v7, %v2637_v39  ;;  %v2648_v46 = vadd.f32 %v2647_v53, %v2646_v33 }
 0x30c   : > { %v2652_v57 = vcombine.low %v2630_v16, %v2639_v45  ;;  %v2666_v28 = vrot.slane %v2648_v46, %v4407_v62 }
 0x30e   : > { %v2659_v35 = vrot.slane %v2652_v57, %v4407_v62 }
 0x310   : > { %v2667_v3 = vcombine.low %v2659_v35, %v2666_v28 }
 0x312   : > { %v2674_v52 = vrot.slane %v2667_v3, %v4407_v62 }
 0x314   : > { %2680 = vst.msk [vmem:[%s4425_s17] ss:$8 sm:$0x7] %vm4420_vm1, %v2674_v52 }
 0x315   : > { %3600 = shalt.err (!%p3597_p0)
}
 0x316   : > { %s3601_s6 = scalar_lea.hbm %s2797_s27, 384  ;;  %s3605_s22 = scalar_lea.hbm %s4501_s2, 768 }
 0x317   : > { %p3602_p5 = scmp.ne.s32.totalorder %s2797_s27, %s3601_s6  ;;  %p3606_p4 = scmp.lt.s32.totalorder %s2797_s27, %s4501_s2 }
 0x318   : > { %p3607_p6 = scmp.lt.s32.totalorder %s3605_s22, %s3601_s6 }
 0x319   : > { %p3603_p9 = pnand %p3602_p5, %p4525_p11 }
 0x31a   : > { %p3608_p8 = por %p3607_p6, %p3606_p4 }
 0x31b   : > { %p3604_p1 = pneg %p3603_p9 }
 0x31d   : > { %p3609_p3 = pnand %p3608_p8, %p3604_p1 }
 0x31f   : > { %3612 = shalt.err (!%p3609_p3)
}
 0x320   : > { %3116 = dma.vmem_to_hbm [thread:$0]  (%p4525_p11), %s2800_s20, 384, %s2797_s27, %s2785_s28  }
 0x321 PF: > { %s2811_s15 = sand.u32 1, %s3643_s9   ;;  %p4526_p7 = scmp.ne.s32.totalorder %s4507_s16, 0 }
 0x322   : > { %p4527_p12 = scmp.ge.s32.totalorder %s3655_s12, 2  ;;  %s2812_s17 = scalar_lea.sflag [#allocation5], %s2811_s15 }
 0x324   : > { %p3127_p10 = pnand %p4527_p12, %p4526_p7 }
 0x326   : > { %p3128_p2 = pneg %p3127_p10 }
 0x328   : > { %3638 = dma.done.wait (%p3128_p2), %s2812_s17, 384  }
 0x329   : > { %3640 = vsyncadd (%p3128_p2), %s2812_s17, 4294966912  ;;  %p16_p13 = scmp.ge.s32.totalorder %s3735_s21, 4   ;;  %s4528_s9 = smov %s3647_s10 }
 0x32a   : > { %s4529_s10 = smov %s3651_s11  ;;  %s4530_s11 = smov %s3752_s29 }
 0x32b   : > { %s4531_s12 = smov %s3735_s21  ;;  %18 = sbr.rel (!%p16_p13) target bundleno = 6 (0x6), region = 79 }
 0x330   :  { %2817 = vsyncpa [#allocation4], 1 }
 0x331   :  { %2819 = vsyncpa [#allocation4 + $0x1], 1 }
 0x332   :  { %2820 = vsyncpa [#allocation7], 1 }
 0x333   :  { %2821 = vsyncpa [#allocation5], 1 }
 0x334   :  { %2823 = vsyncpa [#allocation5 + $0x1], 1 }

</bundles_post_ra>
